<compile_context>
chip_gen: v7x
topology: tpu7x:2x2x1
jax: 0.10.0
libtpu: 0.0.40
codegen_flags: <defaults>
</compile_context>

<pallas_src>
import math
from functools import partial

import jax
import jax.numpy as jnp
from jax.experimental import pallas as pl
from jax.experimental.pallas import tpu as pltpu


_VMEM_LIMIT_BYTES = 32 * 1024 * 1024   # within default/scoped budget on v5e/v6e/v7x


def _default_block_rows():
    """128 rows saturate v5e's 4x128 MXU; 256 fills the 256-wide v6e/v7x MXUs."""
    try:
        kind = jax.devices()[0].device_kind.lower()
    except Exception:
        return 256
    return 128 if "v5" in kind else 256


def _pad_rows(x, multiple):
    rows = x.shape[0]
    padded = ((rows + multiple - 1) // multiple) * multiple
    if padded == rows:
        return x
    pad = [(0, padded - rows)] + [(0, 0)] * (x.ndim - 1)
    return jnp.pad(x, pad)


# ----------------------------- Pallas kernels -----------------------------

def _pairre_kge_kernel(embh_ref, embt_ref, relh_ref, relt_ref, wt_ref, bt_ref, out_ref):
    """KGELoss.pairre: gathers + rel split done in glue; trans/normalize/L1 fused here."""
    head = jnp.dot(embh_ref[...], wt_ref[...], preferred_element_type=jnp.float32) + bt_ref[...]
    tail = jnp.dot(embt_ref[...], wt_ref[...], preferred_element_type=jnp.float32) + bt_ref[...]
    # F.normalize(x, 2, -1, eps=1e-12) == x * rsqrt(max(sum(x^2), eps^2)); rsqrt -> EUP slot
    head = head * jax.lax.rsqrt(jnp.maximum(jnp.sum(head * head, axis=-1, keepdims=True), 1e-24))
    tail = tail * jax.lax.rsqrt(jnp.maximum(jnp.sum(tail * tail, axis=-1, keepdims=True), 1e-24))
    # torch.norm(., p=1, dim=-1)
    score = jnp.sum(jnp.abs(head * relh_ref[...] - tail * relt_ref[...]), axis=-1)  # (TB,)
    out_ref[...] = score[None, :]   # lane-dense (1, TB) store


def _test_score_kernel(embh_ref, embt_ref,
                       wt_ref, bt_ref, wq_ref, bq_ref, wk_ref, bk_ref,
                       hrelT_ref, trelT_ref,
                       w1h_ref, w1t_ref, w1a_ref, w1r_ref, b1_ref,
                       w2_ref, b2_ref, w3_ref, b3_ref,
                       out_ref, *, embed_dim):
    """testSco branch for score_func='pairre' (one row-block of test pairs)."""
    embh = embh_ref[...]
    embt = embt_ref[...]
    # entsEmb = self.trans(testEmb)
    ents_h = jnp.dot(embh, wt_ref[...], preferred_element_type=jnp.float32) + bt_ref[...]
    ents_t = jnp.dot(embt, wt_ref[...], preferred_element_type=jnp.float32) + bt_ref[...]
    # atta = (q(entsEmb[:,0]) * k(entsEmb[:,1])).sum(-1) / sqrt(embed_dim)
    q = jnp.dot(ents_h, wq_ref[...], preferred_element_type=jnp.float32) + bq_ref[...]
    k = jnp.dot(ents_t, wk_ref[...], preferred_element_type=jnp.float32) + bk_ref[...]
    atta = jnp.sum(q * k, axis=-1, keepdims=True) * (1.0 / math.sqrt(embed_dim))     # (TB, 1)
    # relSim = entsEmb[:,0] @ head_relation.T - entsEmb[:,1] @ tail_relation.T
    rel_sim = (jnp.dot(ents_h, hrelT_ref[...], preferred_element_type=jnp.float32)
               - jnp.dot(ents_t, trelT_ref[...], preferred_element_type=jnp.float32))
    # MLP layer 1:  torch.cat([testEmb[:,0], testEmb[:,1], atta, relSim], 1) @ W1 + b1
    # expressed as a sum of partial matmuls so the odd-width (2D+1+2R) concat is never
    # materialized on lanes (atta @ W1_atta is a rank-1 outer product -> broadcast mul).
    h1 = (jnp.dot(embh, w1h_ref[...], preferred_element_type=jnp.float32)
          + jnp.dot(embt, w1t_ref[...], preferred_element_type=jnp.float32)
          + atta * w1a_ref[...]
          + jnp.dot(rel_sim, w1r_ref[...], preferred_element_type=jnp.float32)
          + b1_ref[...])
    h1 = jnp.where(h1 >= 0, h1, 1e-4 * h1)   # LeakyReLU(0.0001); Dropout(0.7) = id (eval)
    h2 = jnp.dot(h1, w2_ref[...], preferred_element_type=jnp.float32) + b2_ref[...]
    h2 = jnp.where(h2 >= 0, h2, 1e-3 * h2)   # LeakyReLU(0.001);  Dropout(0.4) = id (eval)
    h3 = jnp.dot(h2, w3_ref[...], preferred_element_type=jnp.float32) + b3_ref[...]  # (TB, 1)
    out_ref[...] = jax.nn.sigmoid(h3)[:, 0][None, :]   # lane-dense (1, TB) store


# ----------------------------- Pallas wrappers -----------------------------

def pairre_kge(embh, embt, relh, relt, wt, bt, *, block_rows=None):
    E, D = embh.shape
    bs = block_rows or _default_block_rows()
    embh_p, embt_p = _pad_rows(embh, bs), _pad_rows(embt, bs)
    relh_p, relt_p = _pad_rows(relh, bs), _pad_rows(relt, bs)
    Ep = embh_p.shape[0]

    full = lambda a: pl.BlockSpec(a.shape, lambda i: (0, 0))
    rows = lambda c: pl.BlockSpec((bs, c), lambda i: (i, 0))

    out = pl.pallas_call(
        _pairre_kge_kernel,
        out_shape=jax.ShapeDtypeStruct((1, Ep), jnp.float32),
        grid=(Ep // bs,),
        in_specs=[rows(D), rows(D), rows(relh.shape[1]), rows(relt.shape[1]),
                  full(wt), full(bt)],
        out_specs=pl.BlockSpec((1, bs), lambda i: (0, i)),
        compiler_params=pltpu.CompilerParams(
            dimension_semantics=("parallel",),
            vmem_limit_bytes=_VMEM_LIMIT_BYTES),
    )(embh_p, embt_p, relh_p, relt_p, wt, bt)
    return out[0, :E]   # matches torch score shape (E,)


def pairre_test_score(testH, testT, hrelT, trelT, params, embed_dim, *, block_rows=None):
    T, D = testH.shape
    bs = block_rows or _default_block_rows()
    testH_p, testT_p = _pad_rows(testH, bs), _pad_rows(testT, bs)
    Tp = testH_p.shape[0]

    w1 = params["w1"]
    # static slices of the first MLP weight, matching the concat layout
    w1h = w1[:D]
    w1t = w1[D:2 * D]
    w1a = w1[2 * D:2 * D + 1]
    w1r = w1[2 * D + 1:]

    full = lambda a: pl.BlockSpec(a.shape, lambda i: (0, 0))
    rows = lambda c: pl.BlockSpec((bs, c), lambda i: (i, 0))

    args = (testH_p, testT_p,
            params["wt"], params["bt"], params["wq"], params["bq"],
            params["wk"], params["bk"], hrelT, trelT,
            w1h, w1t, w1a, w1r, params["b1"],
            params["w2"], params["b2"], params["w3"], params["b3"])
    in_specs = [rows(D), rows(D)] + [full(a) for a in args[2:]]

    out = pl.pallas_call(
        partial(_test_score_kernel, embed_dim=embed_dim),
        out_shape=jax.ShapeDtypeStruct((1, Tp), jnp.float32),
        grid=(Tp // bs,),
        in_specs=in_specs,
        out_specs=pl.BlockSpec((1, bs), lambda i: (0, i)),
        compiler_params=pltpu.CompilerParams(
            dimension_semantics=("parallel",),
            vmem_limit_bytes=_VMEM_LIMIT_BYTES),
    )(*args)
    return out[0, :T][:, None]   # matches torch mlp output shape (T, 1)


# ----------------------------- model glue -----------------------------

def init_params(key, embed_dim, num_rel):
    """Deterministic nn.Linear-style init.  Weights stored as (in, out) = W.T."""
    d2 = embed_dim // 2
    in_dim = embed_dim * 2 + 1 + num_rel * 2

    def lin(k, fan_in, fan_out):
        kw, kb = jax.random.split(k)
        bound = 1.0 / math.sqrt(fan_in)
        w = jax.random.uniform(kw, (fan_in, fan_out), jnp.float32, -bound, bound)
        b = jax.random.uniform(kb, (1, fan_out), jnp.float32, -bound, bound)
        return w, b

    ks = jax.random.split(key, 6)
    wt, bt = lin(ks[0], embed_dim, d2)          # self.trans
    wq, bq = lin(ks[1], d2, 128)                # self.q
    wk, bk = lin(ks[2], d2, 128)                # self.k
    w1, b1 = lin(ks[3], in_dim, 2048)           # mlp[0]
    w2, b2 = lin(ks[4], 2048, 512)              # mlp[3]
    w3, b3 = lin(ks[5], 512, 1)                 # mlp[6]
    return dict(wt=wt, bt=bt, wq=wq, bq=bq, wk=wk, bk=bk,
                w1=w1, b1=b1, w2=w2, b2=b2, w3=w3, b3=b3)


def gnn_complete_forward(params, all_ent_emb, all_rel_emb, edge_index, edge_type,
                         toTest, embed_dim):
    """mode='train', pretrain=False, score_func='pairre', toTest provided."""
    fetch = {"ent_emb": all_ent_emb, "rel_emb": all_rel_emb}

    # ---- fetch['kge']: the torch.chunk(edge_*, 4096) loop becomes the Pallas row grid ----
    # TODO(synk): gathers stay in XLA; a fully fused in-kernel gather needs per-row manual
    #             DMA (page-table style) which conflicts with the large row-tile blocking.
    embh = all_ent_emb[edge_index[0]]
    embt = all_ent_emb[edge_index[1]]
    rel = all_rel_emb[edge_type]
    relh, relt = jnp.split(rel, 2, axis=-1)   # split in HBM; no in-kernel lane slice
    fetch["kge"] = pairre_kge(embh, embt, relh, relt, params["wt"], params["bt"])

    # ---- fetch['testSco'] (pairre branch) ----
    head_rel, tail_rel = jnp.split(all_rel_emb, 2, axis=-1)
    testH = all_ent_emb[toTest[:, 0]]
    testT = all_ent_emb[toTest[:, 1]]
    fetch["testSco"] = pairre_test_score(testH, testT, head_rel.T, tail_rel.T,
                                         params, embed_dim)
    return fetch


# ----------------------------- pure-JAX reference -----------------------------

def reference_forward(params, all_ent_emb, all_rel_emb, edge_index, edge_type,
                      toTest, embed_dim):
    trans = lambda x: x @ params["wt"] + params["bt"]
    normalize = lambda x: x / jnp.maximum(
        jnp.sqrt(jnp.sum(x * x, -1, keepdims=True)), 1e-12)

    head = normalize(trans(all_ent_emb[edge_index[0]]))
    tail = normalize(trans(all_ent_emb[edge_index[1]]))
    rel = all_rel_emb[edge_type]
    rh, rt = jnp.split(rel, 2, -1)
    kge = jnp.sum(jnp.abs(head * rh - tail * rt), -1)

    testH = all_ent_emb[toTest[:, 0]]
    testT = all_ent_emb[toTest[:, 1]]
    eh, et = trans(testH), trans(testT)
    atta = jnp.sum((eh @ params["wq"] + params["bq"]) * (et @ params["wk"] + params["bk"]),
                   -1, keepdims=True) / math.sqrt(embed_dim)
    hr, tr = jnp.split(all_rel_emb, 2, -1)
    rel_sim = eh @ hr.T - et @ tr.T
    cat = jnp.concatenate([testH, testT, atta, rel_sim], -1)
    h1 = cat @ params["w1"] + params["b1"]
    h1 = jnp.where(h1 >= 0, h1, 1e-4 * h1)
    h2 = h1 @ params["w2"] + params["b2"]
    h2 = jnp.where(h2 >= 0, h2, 1e-3 * h2)
    sco = jax.nn.sigmoid(h2 @ params["w3"] + params["b3"])
    return kge, sco


# ----------------------------- main -----------------------------

if __name__ == "__main__":
    num_ent, embed_dim, num_rel = 64, 32, 8
    num_edges, num_test = 16, 16

    key = jax.random.PRNGKey(0)
    k_param, k_ent, k_rel, k_ei, k_et, k_tt = jax.random.split(key, 6)

    params = init_params(k_param, embed_dim, num_rel)
    # stand-in for CompGCNBase.forward_base output (see TODO above)
    all_ent_emb = 0.1 * jax.random.normal(k_ent, (num_ent, embed_dim), jnp.float32)
    all_rel_emb = 0.1 * jax.random.normal(k_rel, (2 * num_rel, embed_dim), jnp.float32)
    edge_index = jax.random.randint(k_ei, (2, num_edges), 0, num_ent, jnp.int32)
    edge_type = jax.random.randint(k_et, (num_edges,), 0, 2 * num_rel, jnp.int32)
    toTest = jax.random.randint(k_tt, (num_test, 2), 0, num_ent, jnp.int32)

    fetch = gnn_complete_forward(params, all_ent_emb, all_rel_emb,
                                 edge_index, edge_type, toTest, embed_dim)
    jax.block_until_ready(fetch)

    ref_kge, ref_sco = reference_forward(params, all_ent_emb, all_rel_emb,
                                         edge_index, edge_type, toTest, embed_dim)
    assert fetch["kge"].shape == ref_kge.shape and fetch["testSco"].shape == ref_sco.shape
    assert jnp.allclose(fetch["kge"], ref_kge, rtol=1e-3, atol=1e-4), "kge mismatch"
    assert jnp.allclose(fetch["testSco"], ref_sco, rtol=1e-3, atol=1e-4), "testSco mismatch"

    print("KERNEL_OK")
</pallas_src>

<mosaic_0001>
module attributes {stable_mosaic.version = 11 : i64} {
  func.func @_pairre_kge_kernel(%arg0: i32, %arg1: memref<256x32xf32, #tpu.memory_space<vmem>>, %arg2: memref<256x32xf32, #tpu.memory_space<vmem>>, %arg3: memref<256x16xf32, #tpu.memory_space<vmem>>, %arg4: memref<256x16xf32, #tpu.memory_space<vmem>>, %arg5: memref<32x16xf32, #tpu.memory_space<vmem>>, %arg6: memref<1x16xf32, #tpu.memory_space<vmem>>, %arg7: memref<1x256xf32, #tpu.memory_space<vmem>>) attributes {dimension_semantics = [#tpu.dimension_semantics<parallel>], iteration_bounds = array<i64: 1>, scalar_prefetch = 0 : i64, scratch_operands = 0 : i64, tpu.core_type = #tpu.core_type<tc>, window_params = [{transform_indices = @transform_0, window_bounds = array<i64: 256, 32>}, {transform_indices = @transform_1, window_bounds = array<i64: 256, 32>}, {transform_indices = @transform_2, window_bounds = array<i64: 256, 16>}, {transform_indices = @transform_3, window_bounds = array<i64: 256, 16>}, {pipeline_mode = #tpu.pipeline_mode<synchronous>, transform_indices = @transform_4, window_bounds = array<i64: 32, 16>}, {pipeline_mode = #tpu.pipeline_mode<synchronous>, transform_indices = @transform_5, window_bounds = array<i64: 1, 16>}, {transform_indices = @transform_6, window_bounds = array<i64: 1, 256>}]} {
    %c0 = arith.constant 0 : index
    %c0_0 = arith.constant 0 : index
    %0 = vector.load %arg1[%c0, %c0_0] : memref<256x32xf32, #tpu.memory_space<vmem>>, vector<256x32xf32>
    %c0_1 = arith.constant 0 : index
    %c0_2 = arith.constant 0 : index
    %1 = vector.load %arg5[%c0_1, %c0_2] : memref<32x16xf32, #tpu.memory_space<vmem>>, vector<32x16xf32>
    %cst = arith.constant dense<0.000000e+00> : vector<256x16xf32>
    %2 = tpu.matmul %0, %1, %cst {dimension_numbers = #tpu.dot_dimension_numbers<[1], [0], [0], [1], [0, 0, 1, 1], [], []>} : vector<256x32xf32>, vector<32x16xf32>, vector<256x16xf32> -> vector<256x16xf32>
    %c0_3 = arith.constant 0 : index
    %c0_4 = arith.constant 0 : index
    %3 = vector.load %arg6[%c0_3, %c0_4] : memref<1x16xf32, #tpu.memory_space<vmem>>, vector<1x16xf32>
    %4 = vector.broadcast %3 : vector<1x16xf32> to vector<256x16xf32>
    %5 = arith.addf %2, %4 : vector<256x16xf32>
    %c0_5 = arith.constant 0 : index
    %c0_6 = arith.constant 0 : index
    %6 = vector.load %arg2[%c0_5, %c0_6] : memref<256x32xf32, #tpu.memory_space<vmem>>, vector<256x32xf32>
    %c0_7 = arith.constant 0 : index
    %c0_8 = arith.constant 0 : index
    %7 = vector.load %arg5[%c0_7, %c0_8] : memref<32x16xf32, #tpu.memory_space<vmem>>, vector<32x16xf32>
    %cst_9 = arith.constant dense<0.000000e+00> : vector<256x16xf32>
    %8 = tpu.matmul %6, %7, %cst_9 {dimension_numbers = #tpu.dot_dimension_numbers<[1], [0], [0], [1], [0, 0, 1, 1], [], []>} : vector<256x32xf32>, vector<32x16xf32>, vector<256x16xf32> -> vector<256x16xf32>
    %c0_10 = arith.constant 0 : index
    %c0_11 = arith.constant 0 : index
    %9 = vector.load %arg6[%c0_10, %c0_11] : memref<1x16xf32, #tpu.memory_space<vmem>>, vector<1x16xf32>
    %10 = vector.broadcast %9 : vector<1x16xf32> to vector<256x16xf32>
    %11 = arith.addf %8, %10 : vector<256x16xf32>
    %12 = arith.mulf %5, %5 : vector<256x16xf32>
    %cst_12 = arith.constant dense<0.000000e+00> : vector<256xf32>
    %13 = vector.multi_reduction <add>, %12, %cst_12 [1] : vector<256x16xf32> to vector<256xf32>
    %14 = vector.shape_cast %13 : vector<256xf32> to vector<256x1xf32>
    %cst_13 = arith.constant 1.000000e-24 : f32
    %15 = vector.broadcast %cst_13 : f32 to vector<256x1xf32>
    %16 = arith.maximumf %14, %15 : vector<256x1xf32>
    %17 = math.rsqrt %16 : vector<256x1xf32>
    %18 = vector.broadcast %17 : vector<256x1xf32> to vector<256x16xf32>
    %19 = arith.mulf %5, %18 : vector<256x16xf32>
    %20 = arith.mulf %11, %11 : vector<256x16xf32>
    %cst_14 = arith.constant dense<0.000000e+00> : vector<256xf32>
    %21 = vector.multi_reduction <add>, %20, %cst_14 [1] : vector<256x16xf32> to vector<256xf32>
    %22 = vector.shape_cast %21 : vector<256xf32> to vector<256x1xf32>
    %cst_15 = arith.constant 1.000000e-24 : f32
    %23 = vector.broadcast %cst_15 : f32 to vector<256x1xf32>
    %24 = arith.maximumf %22, %23 : vector<256x1xf32>
    %25 = math.rsqrt %24 : vector<256x1xf32>
    %26 = vector.broadcast %25 : vector<256x1xf32> to vector<256x16xf32>
    %27 = arith.mulf %11, %26 : vector<256x16xf32>
    %c0_16 = arith.constant 0 : index
    %c0_17 = arith.constant 0 : index
    %28 = vector.load %arg3[%c0_16, %c0_17] : memref<256x16xf32, #tpu.memory_space<vmem>>, vector<256x16xf32>
    %29 = arith.mulf %19, %28 : vector<256x16xf32>
    %c0_18 = arith.constant 0 : index
    %c0_19 = arith.constant 0 : index
    %30 = vector.load %arg4[%c0_18, %c0_19] : memref<256x16xf32, #tpu.memory_space<vmem>>, vector<256x16xf32>
    %31 = arith.mulf %27, %30 : vector<256x16xf32>
    %32 = arith.subf %29, %31 : vector<256x16xf32>
    %33 = math.absf %32 : vector<256x16xf32>
    %cst_20 = arith.constant dense<0.000000e+00> : vector<256xf32>
    %34 = vector.multi_reduction <add>, %33, %cst_20 [1] : vector<256x16xf32> to vector<256xf32>
    %35 = vector.shape_cast %34 : vector<256xf32> to vector<1x256xf32>
    %c0_21 = arith.constant 0 : index
    %c0_22 = arith.constant 0 : index
    %36 = vector.load %arg7[%c0_21, %c0_22] : memref<1x256xf32, #tpu.memory_space<vmem>>, vector<1x256xf32>
    tpu.vector_store %arg7[%c0_21, %c0_22], %35 {strides = array<i32>} : memref<1x256xf32, #tpu.memory_space<vmem>>, vector<1x256xf32>,
    return
  }
  func.func @transform_0(%arg0: i32) -> (i32, i32) {
    %c0_i32 = arith.constant 0 : i32
    %c0_i32_0 = arith.constant 0 : i32
    return %arg0, %c0_i32 : i32, i32
  }
  func.func @transform_1(%arg0: i32) -> (i32, i32) {
    %c0_i32 = arith.constant 0 : i32
    %c0_i32_0 = arith.constant 0 : i32
    return %arg0, %c0_i32 : i32, i32
  }
  func.func @transform_2(%arg0: i32) -> (i32, i32) {
    %c0_i32 = arith.constant 0 : i32
    %c0_i32_0 = arith.constant 0 : i32
    return %arg0, %c0_i32 : i32, i32
  }
  func.func @transform_3(%arg0: i32) -> (i32, i32) {
    %c0_i32 = arith.constant 0 : i32
    %c0_i32_0 = arith.constant 0 : i32
    return %arg0, %c0_i32 : i32, i32
  }
  func.func @transform_4(%arg0: i32) -> (i32, i32) {
    %c0_i32 = arith.constant 0 : i32
    %c0_i32_0 = arith.constant 0 : i32
    %c0_i32_1 = arith.constant 0 : i32
    return %c0_i32, %c0_i32_0 : i32, i32
  }
  func.func @transform_5(%arg0: i32) -> (i32, i32) {
    %c0_i32 = arith.constant 0 : i32
    %c0_i32_0 = arith.constant 0 : i32
    %c0_i32_1 = arith.constant 0 : i32
    return %c0_i32, %c0_i32_0 : i32, i32
  }
  func.func @transform_6(%arg0: i32) -> (i32, i32) {
    %c0_i32 = arith.constant 0 : i32
    %c0_i32_0 = arith.constant 0 : i32
    return %c0_i32, %arg0 : i32, i32
  }
}

</mosaic_0001>

<bundles_post_ra>
// kernel: tpu_custom_call.1
= control target key start
LH: loop header
LB: loop body
LE: loop exit
PB: predicated region body
PF: predicated region fallthrough
CT: control target
= control target key end

     0   :  { %vm67_vm0 = vcmask 261120   ;;  %s6553_s0 = inlined_call_operand.vmem [shape: f32[256,32], index: 0, kind: input, shape index: {}]   ;;  %s6554_s1 = inlined_call_operand.vmem [shape: f32[256,32], index: 1, kind: input, shape index: {}]   ;;  %s6555_s2 = inlined_call_operand.vmem [shape: f32[256,16], index: 2, kind: input, shape index: {}]   ;;  %s6556_s3 = inlined_call_operand.vmem [shape: f32[256,16], index: 3, kind: input, shape index: {}]   ;;  %s6557_s4 = inlined_call_operand.vmem [shape: f32[32,16], index: 4, kind: input, shape index: {}]   ;;  %s6558_s5 = inlined_call_operand.vmem [shape: f32[1,16], index: 5, kind: input, shape index: {}]   ;;  %s6559_s6 = inlined_call_operand.hbm [shape: f32[1,256], index: 6, kind: output, shape index: {}]  }
   0x1   :  { %v56_v0 = vld [vmem:[%s6557_s4] sm:$0xff]  ;;  %v57_v1 = vld [vmem:[%s6557_s4 + $0x8] sm:$0xff]  ;;  %v58_v2 = vld [vmem:[%s6557_s4 + $0x10] sm:$0xff] }
   0x2   :  { %v4673_v3 = vpack.c.bf16 %v57_v1, %v56_v0  ;;  %v59_v4 = vld [vmem:[%s6557_s4 + $0x18] sm:$0xff]  ;;  %v24_v5 = vld [vmem:[%s6553_s0] sm:$0xff]  ;;  %v25_v8 = vld [vmem:[%s6553_s0 + $0x8] sm:$0xff] }
   0x3   :  { %v389_v6 = vld [vmem:[%s6554_s1] sm:$0xff]  ;;  %v4677_v7 = vpack.c.bf16 %v59_v4, %v58_v2  ;;  %4569 = vmatprep.mubr.msk.f32.mxu0 %vm67_vm0, %v24_v5  ;;  %v390_v9 = vld [vmem:[%s6554_s1 + $0x8] sm:$0xff]  ;;  %v26_v10 = vld [vmem:[%s6553_s0 + $0x10] sm:$0xff] }
   0x4   :  { %4625 = vmatprep.mubr.msk.f32.mxu1 %vm67_vm0, %v389_v6  ;;  %4674 = vmatprep.subr.bf16.mxu0 %v4673_v3  ;;  %v391_v11 = vld [vmem:[%s6554_s1 + $0x10] sm:$0xff]  ;;  %v27_v12 = vld [vmem:[%s6553_s0 + $0x18] sm:$0xff]  ;;  %v393_v14 = vld [vmem:[%s6554_s1 + $0x20] sm:$0xff] }
   0x5   :  { %4682 = vmatprep.subr.bf16.mxu1 %v4673_v3  ;;  %4676 = vmatpush3.bf16.msra.mxu0 %v4673_v3  ;;  %v392_v13 = vld [vmem:[%s6554_s1 + $0x18] sm:$0xff]  ;;  %v28_v15 = vld [vmem:[%s6553_s0 + $0x20] sm:$0xff]  ;;  %v394_v16 = vld [vmem:[%s6554_s1 + $0x28] sm:$0xff] }
   0x6   :  { %4684 = vmatpush3.bf16.msra.mxu1 %v4673_v3  ;;  %4678 = vmatprep.subr.bf16.mxu0 %v4677_v7  ;;  %v29_v17 = vld [vmem:[%s6553_s0 + $0x28] sm:$0xff]  ;;  %v30_v18 = vld [vmem:[%s6553_s0 + $0x30] sm:$0xff]  ;;  %v31_v20 = vld [vmem:[%s6553_s0 + $0x38] sm:$0xff] }
   0x7   :  { %4686 = vmatprep.subr.bf16.mxu1 %v4677_v7  ;;  %v395_v19 = vld [vmem:[%s6554_s1 + $0x30] sm:$0xff]  ;;  %v396_v21 = vld [vmem:[%s6554_s1 + $0x38] sm:$0xff]  ;;  %v32_v22 = vld [vmem:[%s6553_s0 + $0x40] sm:$0xff] }
   0x8   :  { %v397_v23 = vld [vmem:[%s6554_s1 + $0x40] sm:$0xff] }
   0x9   :  { %4680 = vmatpush3.bf16.msra.mxu0 %v4677_v7 }
   0xa   :  { %4688 = vmatpush3.bf16.msra.mxu1 %v4677_v7 }
   0xc   :  { %4570 = vmatmul.mubr.msk.f32.vlgmr.msra.gmra.mrb[0].mxu0 %vm67_vm0, %v25_v8 }
   0xd   :  { %4626 = vmatmul.mubr.msk.f32.vlgmr.msra.gmra.mrb[0].mxu1 %vm67_vm0, %v390_v9  ;;  %4572 = vmatprep.mubr.msk.f32.mxu0 %vm67_vm0, %v26_v10 }
   0xe   :  { %4628 = vmatprep.mubr.msk.f32.mxu1 %vm67_vm0, %v391_v11 }
  0x10   :  { %4573 = vmatmul.mubr.msk.f32.gmra.mrb[2].mxu0 %vm67_vm0, %v27_v12 }
  0x11   :  { %4629 = vmatmul.mubr.msk.f32.gmra.mrb[2].mxu1 %vm67_vm0, %v392_v13  ;;  %4575 = vmatprep.mubr.msk.f32.mxu0 %vm67_vm0, %v28_v15 }
  0x12   :  { %4631 = vmatprep.mubr.msk.f32.mxu1 %vm67_vm0, %v393_v14 }
  0x14   :  { %4576 = vmatmul.mubr.msk.f32.gmra.mrb[4].mxu0 %vm67_vm0, %v29_v17 }
  0x15   :  { %4632 = vmatmul.mubr.msk.f32.gmra.mrb[4].mxu1 %vm67_vm0, %v394_v16  ;;  %4578 = vmatprep.mubr.msk.f32.mxu0 %vm67_vm0, %v30_v18 }
  0x16   :  { %4634 = vmatprep.mubr.msk.f32.mxu1 %vm67_vm0, %v395_v19 }
  0x17   :  { %11 = vsyncpa [#allocation3], 0  ;;  %v33_v24 = vld [vmem:[%s6553_s0 + $0x48] sm:$0xff]  ;;  %v34_v26 = vld [vmem:[%s6553_s0 + $0x50] sm:$0xff]  ;;  %vm774_vm1 = vcmask 130048   ;;  %vm4210_vm2 = vcmask 130112  }
  0x18   :  { %4579 = vmatmul.mubr.msk.f32.gmra.mrb[6].mxu0 %vm67_vm0, %v31_v20  ;;  %v398_v25 = vld [vmem:[%s6554_s1 + $0x48] sm:$0xff]  ;;  %v399_v27 = vld [vmem:[%s6554_s1 + $0x50] sm:$0xff]  ;;  %v35_v28 = vld [vmem:[%s6553_s0 + $0x58] sm:$0xff]  ;;  %vm4217_vm3 = vcmask 195712   ;;  %vm4224_vm4 = vcmask 261312   ;;  %vm4231_vm5 = vcmask 326912  }
  0x19   :  { %4635 = vmatmul.mubr.msk.f32.gmra.mrb[6].mxu1 %vm67_vm0, %v396_v21  ;;  %4581 = vmatprep.mubr.msk.f32.mxu0 %vm67_vm0, %v32_v22  ;;  %v400_v29 = vld [vmem:[%s6554_s1 + $0x58] sm:$0xff]  ;;  %v36_v30 = vld [vmem:[%s6553_s0 + $0x60] sm:$0xff]  ;;  %v37_v32 = vld [vmem:[%s6553_s0 + $0x68] sm:$0xff]  ;;  %vm4238_vm6 = vcmask 392512   ;;  %vm4245_vm7 = vcmask 458112   ;;  %vm4252_vm8 = vcmask 523712  }
  0x1a   :  { %4637 = vmatprep.mubr.msk.f32.mxu1 %vm67_vm0, %v397_v23  ;;  %v401_v31 = vld [vmem:[%s6554_s1 + $0x60] sm:$0xff]  ;;  %v402_v33 = vld [vmem:[%s6554_s1 + $0x68] sm:$0xff]  ;;  %v38_v34 = vld [vmem:[%s6553_s0 + $0x70] sm:$0xff]  ;;  %vm4259_vm9 = vcmask 589312   ;;  %vm4266_vm10 = vcmask 654912   ;;  %vm4273_vm11 = vcmask 720512  }
  0x1b   :  { %v403_v35 = vld [vmem:[%s6554_s1 + $0x70] sm:$0xff]  ;;  %v39_v36 = vld [vmem:[%s6553_s0 + $0x78] sm:$0xff]  ;;  %v40_v38 = vld [vmem:[%s6553_s0 + $0x80] sm:$0xff]  ;;  %vm4280_vm12 = vcmask 786112   ;;  %vm4287_vm13 = vcmask 851712   ;;  %vm4294_vm14 = vcmask 917312  }
  0x1c   :  { %4582 = vmatmul.mubr.msk.f32.gmra.mrb[8].mxu0 %vm67_vm0, %v33_v24  ;;  %v404_v37 = vld [vmem:[%s6554_s1 + $0x78] sm:$0xff]  ;;  %v405_v39 = vld [vmem:[%s6554_s1 + $0x80] sm:$0xff]  ;;  %v41_v40 = vld [vmem:[%s6553_s0 + $0x88] sm:$0xff]  ;;  %vm4301_vm15 = vcmask 982912  }
  0x1d   :  { %4638 = vmatmul.mubr.msk.f32.gmra.mrb[8].mxu1 %vm67_vm0, %v398_v25  ;;  %4584 = vmatprep.mubr.msk.f32.mxu0 %vm67_vm0, %v34_v26  ;;  %v406_v41 = vld [vmem:[%s6554_s1 + $0x88] sm:$0xff]  ;;  %v42_v42 = vld [vmem:[%s6553_s0 + $0x90] sm:$0xff]  ;;  %v43_v44 = vld [vmem:[%s6553_s0 + $0x98] sm:$0xff] }
  0x1e   :  { %4640 = vmatprep.mubr.msk.f32.mxu1 %vm67_vm0, %v399_v27  ;;  %v407_v43 = vld [vmem:[%s6554_s1 + $0x90] sm:$0xff]  ;;  %v408_v45 = vld [vmem:[%s6554_s1 + $0x98] sm:$0xff]  ;;  %v44_v46 = vld [vmem:[%s6553_s0 + $0xa0] sm:$0xff] }
  0x1f   :  { %v409_v47 = vld [vmem:[%s6554_s1 + $0xa0] sm:$0xff]  ;;  %v45_v48 = vld [vmem:[%s6553_s0 + $0xa8] sm:$0xff]  ;;  %v46_v50 = vld [vmem:[%s6553_s0 + $0xb0] sm:$0xff] }
  0x20   :  { %4585 = vmatmul.mubr.msk.f32.gmra.mrb[10].mxu0 %vm67_vm0, %v35_v28  ;;  %v410_v49 = vld [vmem:[%s6554_s1 + $0xa8] sm:$0xff]  ;;  %v411_v51 = vld [vmem:[%s6554_s1 + $0xb0] sm:$0xff]  ;;  %v47_v52 = vld [vmem:[%s6553_s0 + $0xb8] sm:$0xff] }
  0x21   :  { %4641 = vmatmul.mubr.msk.f32.gmra.mrb[10].mxu1 %vm67_vm0, %v400_v29  ;;  %4587 = vmatprep.mubr.msk.f32.mxu0 %vm67_vm0, %v36_v30  ;;  %v412_v53 = vld [vmem:[%s6554_s1 + $0xb8] sm:$0xff]  ;;  %v48_v54 = vld [vmem:[%s6553_s0 + $0xc0] sm:$0xff]  ;;  %v49_v56 = vld [vmem:[%s6553_s0 + $0xc8] sm:$0xff] }
  0x22   :  { %4643 = vmatprep.mubr.msk.f32.mxu1 %vm67_vm0, %v401_v31  ;;  %v413_v55 = vld [vmem:[%s6554_s1 + $0xc0] sm:$0xff]  ;;  %v414_v57 = vld [vmem:[%s6554_s1 + $0xc8] sm:$0xff]  ;;  %v50_v58 = vld [vmem:[%s6553_s0 + $0xd0] sm:$0xff] }
  0x23   :  { %v415_v59 = vld [vmem:[%s6554_s1 + $0xd0] sm:$0xff]  ;;  %v51_v60 = vld [vmem:[%s6553_s0 + $0xd8] sm:$0xff]  ;;  %v52_v62 = vld [vmem:[%s6553_s0 + $0xe0] sm:$0xff] }
  0x24   :  { %4588 = vmatmul.mubr.msk.f32.gmra.mrb[12].mxu0 %vm67_vm0, %v37_v32  ;;  %v416_v61 = vld [vmem:[%s6554_s1 + $0xd8] sm:$0xff]  ;;  %v417_v63 = vld [vmem:[%s6554_s1 + $0xe0] sm:$0xff]  ;;  %v53_v0 = vld [vmem:[%s6553_s0 + $0xe8] sm:$0xff] }
  0x25   :  { %4644 = vmatmul.mubr.msk.f32.gmra.mrb[12].mxu1 %vm67_vm0, %v402_v33  ;;  %4590 = vmatprep.mubr.msk.f32.mxu0 %vm67_vm0, %v38_v34  ;;  %v418_v1 = vld [vmem:[%s6554_s1 + $0xe8] sm:$0xff]  ;;  %v54_v2 = vld [vmem:[%s6553_s0 + $0xf0] sm:$0xff]  ;;  %v55_v4 = vld [vmem:[%s6553_s0 + $0xf8] sm:$0xff] }
  0x26   :  { %4646 = vmatprep.mubr.msk.f32.mxu1 %vm67_vm0, %v403_v35  ;;  %v419_v3 = vld [vmem:[%s6554_s1 + $0xf0] sm:$0xff]  ;;  %v420_v5 = vld [vmem:[%s6554_s1 + $0xf8] sm:$0xff]  ;;  %v5155_v6 = vld [vmem:[%s6558_s5] ss:$0 sm:$0xff] }
  0x28   :  { %4591 = vmatmul.mubr.msk.f32.gmra.mrb[14].mxu0 %vm67_vm0, %v39_v36 }
  0x29   :  { %4647 = vmatmul.mubr.msk.f32.gmra.mrb[14].mxu1 %vm67_vm0, %v404_v37  ;;  %4593 = vmatprep.mubr.msk.f32.mxu0 %vm67_vm0, %v40_v38 }
  0x2a   :  { %4649 = vmatprep.mubr.msk.f32.mxu1 %vm67_vm0, %v405_v39 }
  0x2c   :  { %4594 = vmatmul.mubr.msk.f32.gmra.mrb[16].mxu0 %vm67_vm0, %v41_v40 }
  0x2d   :  { %4650 = vmatmul.mubr.msk.f32.gmra.mrb[16].mxu1 %vm67_vm0, %v406_v41  ;;  %4596 = vmatprep.mubr.msk.f32.mxu0 %vm67_vm0, %v42_v42 }
  0x2e   :  { %4652 = vmatprep.mubr.msk.f32.mxu1 %vm67_vm0, %v407_v43 }
  0x30   :  { %4597 = vmatmul.mubr.msk.f32.gmra.mrb[18].mxu0 %vm67_vm0, %v43_v44 }
  0x31   :  { %4653 = vmatmul.mubr.msk.f32.gmra.mrb[18].mxu1 %vm67_vm0, %v408_v45  ;;  %4599 = vmatprep.mubr.msk.f32.mxu0 %vm67_vm0, %v44_v46 }
  0x32   :  { %4655 = vmatprep.mubr.msk.f32.mxu1 %vm67_vm0, %v409_v47 }
  0x34   :  { %4600 = vmatmul.mubr.msk.f32.gmra.mrb[20].mxu0 %vm67_vm0, %v45_v48 }
  0x35   :  { %4656 = vmatmul.mubr.msk.f32.gmra.mrb[20].mxu1 %vm67_vm0, %v410_v49  ;;  %4602 = vmatprep.mubr.msk.f32.mxu0 %vm67_vm0, %v46_v50 }
  0x36   :  { %4658 = vmatprep.mubr.msk.f32.mxu1 %vm67_vm0, %v411_v51 }
  0x38   :  { %4603 = vmatmul.mubr.msk.f32.gmra.mrb[22].mxu0 %vm67_vm0, %v47_v52 }
  0x39   :  { %4659 = vmatmul.mubr.msk.f32.gmra.mrb[22].mxu1 %vm67_vm0, %v412_v53  ;;  %4605 = vmatprep.mubr.msk.f32.mxu0 %vm67_vm0, %v48_v54 }
  0x3a   :  { %4661 = vmatprep.mubr.msk.f32.mxu1 %vm67_vm0, %v413_v55 }
  0x3c   :  { %4606 = vmatmul.mubr.msk.f32.gmra.mrb[24].mxu0 %vm67_vm0, %v49_v56 }
  0x3d   :  { %4662 = vmatmul.mubr.msk.f32.gmra.mrb[24].mxu1 %vm67_vm0, %v414_v57  ;;  %4608 = vmatprep.mubr.msk.f32.mxu0 %vm67_vm0, %v50_v58 }
  0x3e   :  { %4664 = vmatprep.mubr.msk.f32.mxu1 %vm67_vm0, %v415_v59 }
  0x40   :  { %4609 = vmatmul.mubr.msk.f32.gmra.mrb[26].mxu0 %vm67_vm0, %v51_v60 }
  0x41   :  { %4665 = vmatmul.mubr.msk.f32.gmra.mrb[26].mxu1 %vm67_vm0, %v416_v61  ;;  %4611 = vmatprep.mubr.msk.f32.mxu0 %vm67_vm0, %v52_v62 }
  0x42   :  { %4667 = vmatprep.mubr.msk.f32.mxu1 %vm67_vm0, %v417_v63 }
  0x44   :  { %4612 = vmatmul.mubr.msk.f32.gmra.mrb[28].mxu0 %vm67_vm0, %v53_v0 }
  0x45   :  { %4668 = vmatmul.mubr.msk.f32.gmra.mrb[28].mxu1 %vm67_vm0, %v418_v1  ;;  %4614 = vmatprep.mubr.msk.f32.mxu0 %vm67_vm0, %v54_v2 }
  0x46   :  { %4670 = vmatprep.mubr.msk.f32.mxu1 %vm67_vm0, %v419_v3 }
  0x48   :  { %4615 = vmatmul.mubr.msk.f32.gmra.mrb[30].mxu0 %vm67_vm0, %v55_v4 }
  0x49   :  { %4671 = vmatmul.mubr.msk.f32.gmra.mrb[30].mxu1 %vm67_vm0, %v420_v5  ;;  %vm4308_vm0 = vcmask 1048512  }
  0xdf   :  { %v4571_v7 = vpop.f32.mrb[0].mxu0 }
  0xe0   :  { %v4627_v8 = vpop.f32.mrb[0].mxu1  ;;  %v5158_v9 = vadd.f32 %v4571_v7, %v5155_v6  ;;  %v230_v11 = vpop.f32.mrb[1].mxu0 }
  0xe1   :  { %v5161_v10 = vadd.f32 %v4627_v8, %v5155_v6  ;;  %v583_v12 = vpop.f32.mrb[1].mxu1  ;;  %v5164_v13 = vadd.f32 %v5155_v6, %v230_v11 }
  0xe2   :  { %v5167_v14 = vadd.f32 %v5155_v6, %v583_v12  ;;  %v743_v16 = vmul.f32 %v5158_v9, %v5158_v9 }
  0xe3   :  { %v968_v15 = vmul.f32 %v5161_v10, %v5161_v10  ;;  %v4574_v17 = vpop.f32.mrb[2].mxu0  ;;  %v742_v19 = vmul.f32 %v5164_v13, %v5164_v13 }
  0xe4   :  { %v4630_v18 = vpop.f32.mrb[2].mxu1  ;;  %v5176_v20 = vadd.f32 %v4574_v17, %v5155_v6  ;;  %v778_v22 = vsel %vm774_vm1, %v743_v16, 0.0  ;;  %v240_v25 = vpop.f32.mrb[3].mxu0  ;;  %v967_v27 = vmul.f32 %v5167_v14, %v5167_v14 }
  0xe5   :  { %v1002_v21 = vsel %vm774_vm1, %v968_v15, 0.0  ;;  %v5181_v23 = vadd.f32 %v4630_v18, %v5155_v6  ;;  %v593_v24 = vpop.f32.mrb[3].mxu1  ;;  %779 = vadd.xlane.f32.xlu0 %v778_v22  ;;  %v5184_v26 = vadd.f32 %v5155_v6, %v240_v25  ;;  %v775_v34 = vsel %vm774_vm1, %v742_v19, 0.0 }
  0xe6   :  { %1003 = vadd.xlane.f32.xlu1 %v1002_v21  ;;  %v745_v28 = vmul.f32 %v5176_v20, %v5176_v20  ;;  %v5191_v29 = vadd.f32 %v5155_v6, %v593_v24  ;;  %v999_v37 = vsel %vm774_vm1, %v967_v27, 0.0 }
  0xe7   :  { %v970_v30 = vmul.f32 %v5181_v23, %v5181_v23  ;;  %v4577_v32 = vpop.f32.mrb[4].mxu0  ;;  %v744_v38 = vmul.f32 %v5184_v26, %v5184_v26 }
  0xe8   :  { %v4633_v31 = vpop.f32.mrb[4].mxu1  ;;  %v784_v33 = vsel %vm774_vm1, %v745_v28, 0.0  ;;  %v250_v36 = vpop.f32.mrb[5].mxu0  ;;  %v5205_v41 = vadd.f32 %v4577_v32, %v5155_v6  ;;  %v969_v42 = vmul.f32 %v5191_v29, %v5191_v29 }
  0xe9   :  { %v603_v35 = vpop.f32.mrb[5].mxu1  ;;  %776 = vadd.xlane.f32.xlu0 %v775_v34  ;;  %v1008_v39 = vsel %vm774_vm1, %v970_v30, 0.0  ;;  %v5202_v40 = vadd.f32 %v4633_v31, %v5155_v6  ;;  %v781_v47 = vsel %vm774_vm1, %v744_v38, 0.0  ;;  %v5213_v48 = vadd.f32 %v5155_v6, %v250_v36 }
  0xea   :  { %785 = vadd.xlane.f32.xlu1 %v784_v33  ;;  %v1005_v49 = vsel %vm774_vm1, %v969_v42, 0.0  ;;  %v747_v51 = vmul.f32 %v5205_v41, %v5205_v41  ;;  %v5239_v0 = vadd.f32 %v5155_v6, %v603_v35 }
  0xeb   :  { %v4580_v43 = vpop.f32.mrb[6].mxu0  ;;  %v972_v52 = vmul.f32 %v5202_v40, %v5202_v40  ;;  %v746_v57 = vmul.f32 %v5213_v48, %v5213_v48 }
  0xec   :  { %v4636_v44 = vpop.f32.mrb[6].mxu1  ;;  %v260_v45 = vpop.f32.mrb[7].mxu0  ;;  %v5217_v50 = vadd.f32 %v4580_v43, %v5155_v6  ;;  %v790_v58 = vsel %vm774_vm1, %v747_v51, 0.0  ;;  %v971_v15 = vmul.f32 %v5239_v0, %v5239_v0 }
  0xed   :  { %v5209_v46 = vpop.f32.mrb[7].mxu1  ;;  %1000 = vadd.xlane.f32.xlu0 %v999_v37  ;;  %v1014_v59 = vsel %vm774_vm1, %v972_v52, 0.0  ;;  %v5246_v3 = vadd.f32 %v4636_v44, %v5155_v6  ;;  %v787_v5 = vsel %vm774_vm1, %v746_v57, 0.0  ;;  %v5261_v19 = vadd.f32 %v5155_v6, %v260_v45 }
  0xee   :  { %1009 = vadd.xlane.f32.xlu1 %v1008_v39  ;;  %v749_v61 = vmul.f32 %v5217_v50, %v5217_v50  ;;  %v1011_v32 = vsel %vm774_vm1, %v971_v15, 0.0 }
  0xef   :  { %v4583_v53 = vpop.f32.mrb[8].mxu0  ;;  %v974_v28 = vmul.f32 %v5246_v3, %v5246_v3  ;;  %v748_v36 = vmul.f32 %v5261_v19, %v5261_v19 }
  0xf0   :  { %v4639_v54 = vpop.f32.mrb[8].mxu1  ;;  %v5223_v55 = vpop.f32.mrb[9].mxu0  ;;  %v5232_v60 = vadd.f32 %v4583_v53, %v5155_v6  ;;  %v796_v4 = vsel %vm774_vm1, %v749_v61, 0.0 }
  0xf1   :  { %v5225_v56 = vpop.f32.mrb[9].mxu1  ;;  %1006 = vadd.xlane.f32.xlu0 %v1005_v49  ;;  %v1020_v42 = vsel %vm774_vm1, %v974_v28, 0.0  ;;  %v5298_v49 = vadd.f32 %v5155_v6, %v5209_v46  ;;  %v5301_v53 = vadd.f32 %v4639_v54, %v5155_v6  ;;  %v793_v61 = vsel %vm774_vm1, %v748_v36, 0.0 }
  0xf2   :  { %782 = vadd.xlane.f32.xlu1 %v781_v47  ;;  %v751_v8 = vmul.f32 %v5232_v60, %v5232_v60 }
  0xf3   :  { %v4586_v62 = vpop.f32.mrb[10].mxu0  ;;  %v973_v54 = vmul.f32 %v5298_v49, %v5298_v49 }
  0xf4   :  { %v5236_v63 = vpop.f32.mrb[10].mxu1  ;;  %v5241_v1 = vpop.f32.mrb[11].mxu0  ;;  %v5251_v7 = vadd.f32 %v4586_v62, %v5155_v6  ;;  %v802_v24 = vsel %vm774_vm1, %v751_v8, 0.0 }
  0xf5   :  { %v5243_v2 = vpop.f32.mrb[11].mxu1  ;;  %1015 = vadd.xlane.f32.xlu0 %v1014_v59 }
  0xf6   :  { %791 = vadd.xlane.f32.xlu1 %v790_v58  ;;  %v753_v27 = vmul.f32 %v5251_v7, %v5251_v7 }
  0xf7   :  { %v4589_v11 = vpop.f32.mrb[12].mxu0 }
  0xf8   :  { %v4645_v12 = vpop.f32.mrb[12].mxu1  ;;  %v290_v16 = vpop.f32.mrb[13].mxu0  ;;  %v5271_v25 = vadd.f32 %v4589_v11, %v5155_v6  ;;  %v808_v39 = vsel %vm774_vm1, %v753_v27, 0.0 }
  0xf9   :  { %v5258_v17 = vadd.f32 %v4645_v12, %v5155_v6  ;;  %v643_v18 = vpop.f32.mrb[13].mxu1  ;;  %788 = vadd.xlane.f32.xlu0 %v787_v5  ;;  %v5264_v21 = vadd.f32 %v5155_v6, %v290_v16  ;;  %v5320_v12 = vadd.f32 %v5155_v6, %v5223_v55  ;;  %v976_v55 = vmul.f32 %v5301_v53, %v5301_v53 }
  0xfa   :  { %797 = vadd.xlane.f32.xlu1 %v796_v4  ;;  %v5267_v22 = vadd.f32 %v5155_v6, %v643_v18  ;;  %6580 = vst [vmem:[#allocation5_spill] sm:$0xff] %v5271_v25  ;;  %v755_v44 = vmul.f32 %v5271_v25, %v5271_v25 }
  0xfb   :  { %v4592_v30 = vpop.f32.mrb[14].mxu0 }
  0xfc   :  { %v4648_v31 = vpop.f32.mrb[14].mxu1  ;;  %v300_v33 = vpop.f32.mrb[15].mxu0  ;;  %v5292_v43 = vadd.f32 %v4592_v30, %v5155_v6  ;;  %v814_v59 = vsel %vm774_vm1, %v755_v44, 0.0  ;;  %v1026_v44 = vsel %vm774_vm1, %v976_v55, 0.0 }
  0xfd   :  { %v5279_v34 = vadd.f32 %v4648_v31, %v5155_v6  ;;  %v653_v35 = vpop.f32.mrb[15].mxu1  ;;  %1012 = vadd.xlane.f32.xlu0 %v1011_v32  ;;  %v5284_v37 = vadd.f32 %v5155_v6, %v300_v33  ;;  %v1017_v31 = vsel %vm774_vm1, %v973_v54, 0.0 }
  0xfe   :  { %803 = vadd.xlane.f32.xlu1 %v802_v24  ;;  %v5287_v38 = vadd.f32 %v5155_v6, %v653_v35  ;;  %6581 = vst [vmem:[#allocation6_spill] sm:$0xff] %v5292_v43  ;;  %v757_v62 = vmul.f32 %v5292_v43, %v5292_v43  ;;  %v750_v35 = vmul.f32 %v5320_v12, %v5320_v12 }
  0xff   :  { %v4595_v45 = vpop.f32.mrb[16].mxu0 }
 0x100   :  { %v4651_v47 = vpop.f32.mrb[16].mxu1  ;;  %v310_v51 = vpop.f32.mrb[17].mxu0  ;;  %v5312_v46 = vadd.f32 %v4595_v45, %v5155_v6  ;;  %v820_v18 = vsel %vm774_vm1, %v757_v62, 0.0 }
 0x101   :  { %v663_v52 = vpop.f32.mrb[17].mxu1  ;;  %1021 = vadd.xlane.f32.xlu0 %v1020_v42  ;;  %v5304_v57 = vadd.f32 %v5155_v6, %v310_v51  ;;  %v5330_v24 = vadd.f32 %v4651_v47, %v5155_v6 }
 0x102   :  { %809 = vadd.xlane.f32.xlu1 %v808_v39  ;;  %v5307_v58 = vadd.f32 %v5155_v6, %v663_v52  ;;  %6582 = vst [vmem:[#allocation7_spill] sm:$0xff] %v5312_v46  ;;  %v759_v27 = vmul.f32 %v5312_v46, %v5312_v46 }
 0x103   :  { %v4598_v4 = vpop.f32.mrb[18].mxu0  ;;  %6583 = vst [vmem:[#allocation8_spill] sm:$0xff] %v5330_v24  ;;  %v984_v47 = vmul.f32 %v5330_v24, %v5330_v24  ;;  %v5429_v24 = vadd.f32 %v5155_v6, %v5243_v2 }
 0x104   :  { %v4654_v5 = vpop.f32.mrb[18].mxu1  ;;  %v320_v8 = vpop.f32.mrb[19].mxu0  ;;  %v826_v42 = vsel %vm774_vm1, %v759_v27, 0.0  ;;  %v5348_v45 = vadd.f32 %v4598_v4, %v5155_v6  ;;  %v5364_v4 = vadd.f32 %v5236_v63, %v5155_v6  ;;  %v799_v27 = vsel %vm774_vm1, %v750_v35, 0.0 }
 0x105   :  { %v673_v11 = vpop.f32.mrb[19].mxu1  ;;  %794 = vadd.xlane.f32.xlu0 %v793_v61  ;;  %v5323_v15 = vadd.f32 %v5155_v6, %v320_v8  ;;  %v5375_v55 = vadd.f32 %v4654_v5, %v5155_v6  ;;  %v5389_v5 = vadd.f32 %v5155_v6, %v5241_v1  ;;  %6595 = vst [vmem:[#allocation20_spill] sm:$0xff] %v5429_v24 }
 0x106   :  { %815 = vadd.xlane.f32.xlu1 %v814_v59  ;;  %v5326_v16 = vadd.f32 %v5155_v6, %v673_v11  ;;  %6584 = vst [vmem:[#allocation9_spill] sm:$0xff] %v5348_v45  ;;  %v5354_v59 = vadd.f32 %v5155_v6, %v5225_v56  ;;  %6586 = vst [vmem:[#allocation11_spill] sm:$0xff] %v5364_v4  ;;  %v978_v1 = vmul.f32 %v5364_v4, %v5364_v4 }
 0x107   :  { %v4601_v28 = vpop.f32.mrb[20].mxu0  ;;  %6587 = vst [vmem:[#allocation12_spill] sm:$0xff] %v5375_v55  ;;  %6590 = vst [vmem:[#allocation15_spill] sm:$0xff] %v5389_v5  ;;  %v977_v4 = vmul.f32 %v5429_v24, %v5429_v24 }
 0x108   :  { %v4657_v30 = vpop.f32.mrb[20].mxu1  ;;  %v330_v33 = vpop.f32.mrb[21].mxu0 }
 0x109   :  { %v683_v32 = vpop.f32.mrb[21].mxu1  ;;  %1018 = vadd.xlane.f32.xlu0 %v1017_v31  ;;  %v5343_v39 = vadd.f32 %v5155_v6, %v330_v33  ;;  %v761_v31 = vmul.f32 %v5348_v45, %v5348_v45  ;;  %v975_v33 = vmul.f32 %v5354_v59, %v5354_v59 }
 0x10a   :  { %821 = vadd.xlane.f32.xlu1 %v820_v18  ;;  %v5340_v36 = vadd.f32 %v5155_v6, %v683_v32  ;;  %v1050_v18 = vsel %vm774_vm1, %v984_v47, 0.0 }
 0x10b   :  { %v4604_v51 = vpop.f32.mrb[22].mxu0 }
 0x10c   :  { %v4660_v52 = vpop.f32.mrb[22].mxu1  ;;  %v5357_v61 = vadd.f32 %v4604_v51, %v5155_v6  ;;  %v340_v8 = vpop.f32.mrb[23].mxu0  ;;  %v987_v24 = vmul.f32 %v5340_v36, %v5340_v36 }
 0x10d   :  { %v5360_v62 = vadd.f32 %v4660_v52, %v5155_v6  ;;  %v693_v54 = vpop.f32.mrb[23].mxu1  ;;  %1027 = vadd.xlane.f32.xlu0 %v1026_v44  ;;  %v5370_v56 = vadd.f32 %v5155_v6, %v340_v8  ;;  %v5399_v8 = vadd.f32 %v4601_v28, %v5155_v6  ;;  %v752_v28 = vmul.f32 %v5389_v5, %v5389_v5 }
 0x10e   :  { %6585 = vst [vmem:[#allocation10_spill] sm:$0xff] %v5357_v61  ;;  %827 = vadd.xlane.f32.xlu1 %v826_v42  ;;  %v5367_v11 = vadd.f32 %v5155_v6, %v693_v54  ;;  %v832_v54 = vsel %vm774_vm1, %v761_v31, 0.0 }
 0x10f   :  { %v4607_v63 = vpop.f32.mrb[24].mxu0  ;;  %6591 = vst [vmem:[#allocation16_spill] sm:$0xff] %v5399_v8  ;;  %v805_v2 = vsel %vm774_vm1, %v752_v28, 0.0 }
 0x110   :  { %v4663_v32 = vpop.f32.mrb[24].mxu1  ;;  %v5382_v42 = vadd.f32 %v4607_v63, %v5155_v6  ;;  %v350_v51 = vpop.f32.mrb[25].mxu0  ;;  %v986_v63 = vmul.f32 %v5375_v55, %v5375_v55 }
 0x111   :  { %v5385_v44 = vadd.f32 %v4663_v32, %v5155_v6  ;;  %v703_v47 = vpop.f32.mrb[25].mxu1  ;;  %800 = vadd.xlane.f32.xlu0 %v799_v27  ;;  %v5395_v52 = vadd.f32 %v5155_v6, %v350_v51  ;;  %v1023_v27 = vsel %vm774_vm1, %v975_v33, 0.0 }
 0x112   :  { %6588 = vst [vmem:[#allocation13_spill] sm:$0xff] %v5382_v42  ;;  %1051 = vadd.xlane.f32.xlu1 %v1050_v18  ;;  %v5392_v35 = vadd.f32 %v5155_v6, %v703_v47  ;;  %v1056_v33 = vsel %vm774_vm1, %v986_v63, 0.0 }
 0x113   :  { %6589 = vst [vmem:[#allocation14_spill] sm:$0xff] %v5385_v44  ;;  %v4610_v32 = vpop.f32.mrb[26].mxu0 }
 0x114   :  { %v4666_v18 = vpop.f32.mrb[26].mxu1  ;;  %v5407_v47 = vadd.f32 %v4610_v32, %v5155_v6  ;;  %v360_v45 = vpop.f32.mrb[27].mxu0  ;;  %v1032_v32 = vsel %vm774_vm1, %v978_v1, 0.0 }
 0x115   :  { %v5410_v51 = vadd.f32 %v4666_v18, %v5155_v6  ;;  %v713_v31 = vpop.f32.mrb[27].mxu1  ;;  %1024 = vadd.xlane.f32.xlu0 %v1023_v27  ;;  %v5418_v43 = vadd.f32 %v5155_v6, %v360_v45  ;;  %v5423_v18 = vadd.f32 %v4657_v30, %v5155_v6 }
 0x116   :  { %6592 = vst [vmem:[#allocation17_spill] sm:$0xff] %v5407_v47  ;;  %833 = vadd.xlane.f32.xlu1 %v832_v54  ;;  %v5415_v55 = vadd.f32 %v5155_v6, %v713_v31  ;;  %v763_v54 = vmul.f32 %v5399_v8, %v5399_v8 }
 0x117   :  { %6593 = vst [vmem:[#allocation18_spill] sm:$0xff] %v5410_v51  ;;  %6594 = vst [vmem:[#allocation19_spill] sm:$0xff] %v5423_v18  ;;  %v4613_v27 = vpop.f32.mrb[28].mxu0 }
 0x118   :  { %v4669_v46 = vpop.f32.mrb[28].mxu1  ;;  %v5432_v31 = vadd.f32 %v4613_v27, %v5155_v6  ;;  %v370_v1 = vpop.f32.mrb[29].mxu0  ;;  %v838_v25 = vsel %vm774_vm1, %v763_v54, 0.0  ;;  %v988_v27 = vmul.f32 %v5423_v18, %v5423_v18 }
 0x119   :  { %v5435_v45 = vadd.f32 %v4669_v46, %v5155_v6  ;;  %v723_v63 = vpop.f32.mrb[29].mxu1  ;;  %1033 = vadd.xlane.f32.xlu0 %v1032_v32  ;;  %v5441_v8 = vadd.f32 %v5155_v6, %v370_v1 }
 0x11a   :  { %6596 = vst [vmem:[#allocation21_spill] sm:$0xff] %v5432_v31  ;;  %1057 = vadd.xlane.f32.xlu1 %v1056_v33  ;;  %v5438_v30 = vadd.f32 %v5155_v6, %v723_v63  ;;  %v1062_v18 = vsel %vm774_vm1, %v988_v27, 0.0  ;;  %v754_v27 = vmul.f32 %v5264_v21, %v5264_v21 }
 0x11b   :  { %6597 = vst [vmem:[#allocation22_spill] sm:$0xff] %v5435_v45  ;;  %v4616_v5 = vpop.f32.mrb[30].mxu0 }
 0x11c   :  { %v4672_v46 = vpop.f32.mrb[30].mxu1  ;;  %v5450_v33 = vadd.f32 %v4616_v5, %v5155_v6  ;;  %v380_v32 = vpop.f32.mrb[31].mxu0  ;;  %v980_v5 = vmul.f32 %v5258_v17, %v5258_v17 }
 0x11d   :  { %v5453_v63 = vadd.f32 %v4672_v46, %v5155_v6  ;;  %v733_v1 = vpop.f32.mrb[31].mxu1  ;;  %806 = vadd.xlane.f32.xlu0 %v805_v2  ;;  %v5456_v28 = vadd.f32 %v5155_v6, %v380_v32  ;;  %v1029_v46 = vsel %vm774_vm1, %v977_v4, 0.0  ;;  %v990_v4 = vmul.f32 %v5360_v62, %v5360_v62 }
 0x11e   :  { %6598 = vst [vmem:[#allocation23_spill] sm:$0xff] %v5450_v33  ;;  %839 = vadd.xlane.f32.xlu1 %v838_v25  ;;  %v5459_v54 = vadd.f32 %v5155_v6, %v733_v1  ;;  %v1059_v25 = vsel %vm774_vm1, %v987_v24, 0.0  ;;  %v1038_v2 = vsel %vm774_vm1, %v980_v5, 0.0  ;;  %v765_v6 = vmul.f32 %v5357_v61, %v5357_v61 }
 0x11f   :  { %6599 = vst [vmem:[#allocation24_spill] sm:$0xff] %v5453_v63  ;;  %v811_v1 = vsel %vm774_vm1, %v754_v27, 0.0  ;;  %v979_v24 = vmul.f32 %v5267_v22, %v5267_v22  ;;  %v989_v5 = vmul.f32 %v5367_v11, %v5367_v11  ;;  %v767_v27 = vmul.f32 %v5382_v42, %v5382_v42 }
 0x120   :  { %v844_v32 = vsel %vm774_vm1, %v765_v6, 0.0 }
 0x121   :  { %1030 = vadd.xlane.f32.xlu0 %v1029_v46  ;;  %v756_v46 = vmul.f32 %v5284_v37, %v5284_v37 }
 0x122   :  { %1063 = vadd.xlane.f32.xlu1 %v1062_v18  ;;  %v1068_v18 = vsel %vm774_vm1, %v990_v4, 0.0 }
 0x123   :  { %v817_v6 = vsel %vm774_vm1, %v756_v46, 0.0 }
 0x125   :  { %1039 = vadd.xlane.f32.xlu0 %v1038_v2  ;;  %v1065_v2 = vsel %vm774_vm1, %v989_v5, 0.0 }
 0x126   :  { %1060 = vadd.xlane.f32.xlu1 %v1059_v25  ;;  %v1035_v25 = vsel %vm774_vm1, %v979_v24, 0.0  ;;  %v992_v24 = vmul.f32 %v5385_v44, %v5385_v44 }
 0x128   :  { %v1074_v5 = vsel %vm774_vm1, %v992_v24, 0.0 }
 0x129   :  { %812 = vadd.xlane.f32.xlu0 %v811_v1  ;;  %v850_v1 = vsel %vm774_vm1, %v767_v27, 0.0 }
 0x12a   :  { %845 = vadd.xlane.f32.xlu1 %v844_v32  ;;  %v981_v32 = vmul.f32 %v5287_v38, %v5287_v38 }
 0x12c   :  { %v1041_v4 = vsel %vm774_vm1, %v981_v32, 0.0  ;;  %v769_v32 = vmul.f32 %v5407_v47, %v5407_v47 }
 0x12d   :  { %1036 = vadd.xlane.f32.xlu0 %v1035_v25  ;;  %v991_v25 = vmul.f32 %v5392_v35, %v5392_v35 }
 0x12e   :  { %1069 = vadd.xlane.f32.xlu1 %v1068_v18  ;;  %v758_v18 = vmul.f32 %v5304_v57, %v5304_v57 }
 0x130   :  { %v823_v46 = vsel %vm774_vm1, %v758_v18, 0.0  ;;  %v994_v18 = vmul.f32 %v5410_v51, %v5410_v51 }
 0x131   :  { %818 = vadd.xlane.f32.xlu0 %v817_v6  ;;  %v1071_v6 = vsel %vm774_vm1, %v991_v25, 0.0 }
 0x132   :  { %1066 = vadd.xlane.f32.xlu1 %v1065_v2  ;;  %v983_v2 = vmul.f32 %v5307_v58, %v5307_v58 }
 0x134   :  { %v1047_v27 = vsel %vm774_vm1, %v983_v2, 0.0  ;;  %v993_v2 = vmul.f32 %v5415_v55, %v5415_v55 }
 0x135   :  { %1042 = vadd.xlane.f32.xlu0 %v1041_v4  ;;  %v856_v4 = vsel %vm774_vm1, %v769_v32, 0.0 }
 0x136   :  { %851 = vadd.xlane.f32.xlu1 %v850_v1  ;;  %v760_v1 = vmul.f32 %v5323_v15, %v5323_v15 }
 0x138   :  { %v829_v24 = vsel %vm774_vm1, %v760_v1, 0.0  ;;  %v771_v1 = vmul.f32 %v5432_v31, %v5432_v31 }
 0x139   :  { %824 = vadd.xlane.f32.xlu0 %v823_v46  ;;  %v1080_v46 = vsel %vm774_vm1, %v994_v18, 0.0 }
 0x13a   :  { %1075 = vadd.xlane.f32.xlu1 %v1074_v5  ;;  %v985_v5 = vmul.f32 %v5326_v16, %v5326_v16 }
 0x13c   :  { %v1053_v25 = vsel %vm774_vm1, %v985_v5, 0.0  ;;  %v996_v5 = vmul.f32 %v5435_v45, %v5435_v45 }
 0x13d   :  { %1048 = vadd.xlane.f32.xlu0 %v1047_v27  ;;  %v1077_v27 = vsel %vm774_vm1, %v993_v2, 0.0 }
 0x13e   :  { %1072 = vadd.xlane.f32.xlu1 %v1071_v6  ;;  %v762_v6 = vmul.f32 %v5343_v39, %v5343_v39 }
 0x140   :  { %v835_v32 = vsel %vm774_vm1, %v762_v6, 0.0  ;;  %v995_v6 = vmul.f32 %v5438_v30, %v5438_v30 }
 0x141   :  { %830 = vadd.xlane.f32.xlu0 %v829_v24  ;;  %v862_v24 = vsel %vm774_vm1, %v771_v1, 0.0 }
 0x142   :  { %857 = vadd.xlane.f32.xlu1 %v856_v4  ;;  %v764_v4 = vmul.f32 %v5370_v56, %v5370_v56 }
 0x144   :  { %v841_v18 = vsel %vm774_vm1, %v764_v4, 0.0  ;;  %v773_v4 = vmul.f32 %v5450_v33, %v5450_v33 }
 0x145   :  { %1054 = vadd.xlane.f32.xlu0 %v1053_v25  ;;  %v1086_v25 = vsel %vm774_vm1, %v996_v5, 0.0 }
 0x146   :  { %1081 = vadd.xlane.f32.xlu1 %v1080_v46  ;;  %v766_v46 = vmul.f32 %v5395_v52, %v5395_v52 }
 0x148   :  { %v847_v2 = vsel %vm774_vm1, %v766_v46, 0.0  ;;  %v997_v46 = vmul.f32 %v5459_v54, %v5459_v54 }
 0x149   :  { %836 = vadd.xlane.f32.xlu0 %v835_v32  ;;  %v1083_v32 = vsel %vm774_vm1, %v995_v6, 0.0 }
 0x14a   :  { %1078 = vadd.xlane.f32.xlu1 %v1077_v27  ;;  %v768_v27 = vmul.f32 %v5418_v43, %v5418_v43 }
 0x14c   :  { %v853_v1 = vsel %vm774_vm1, %v768_v27, 0.0  ;;  %v998_v27 = vmul.f32 %v5453_v63, %v5453_v63 }
 0x14d   :  { %842 = vadd.xlane.f32.xlu0 %v841_v18  ;;  %v868_v18 = vsel %vm774_vm1, %v773_v4, 0.0 }
 0x14e   :  { %863 = vadd.xlane.f32.xlu1 %v862_v24  ;;  %v770_v24 = vmul.f32 %v5441_v8, %v5441_v8 }
 0x150   :  { %v859_v5 = vsel %vm774_vm1, %v770_v24, 0.0 }
 0x151   :  { %848 = vadd.xlane.f32.xlu0 %v847_v2  ;;  %v1089_v2 = vsel %vm774_vm1, %v997_v46, 0.0 }
 0x152   :  { %1087 = vadd.xlane.f32.xlu1 %v1086_v25  ;;  %v772_v25 = vmul.f32 %v5456_v28, %v5456_v28 }
 0x154   :  { %v865_v6 = vsel %vm774_vm1, %v772_v25, 0.0 }
 0x155   :  { %854 = vadd.xlane.f32.xlu0 %v853_v1  ;;  %v1092_v1 = vsel %vm774_vm1, %v998_v27, 0.0 }
 0x156   :  { %1084 = vadd.xlane.f32.xlu1 %v1083_v32  ;;  %v982_v32 = vmul.f32 %v5279_v34, %v5279_v34 }
 0x158   :  { %v1044_v4 = vsel %vm774_vm1, %v982_v32, 0.0 }
 0x159   :  { %860 = vadd.xlane.f32.xlu0 %v859_v5 }
 0x15a   :  { %869 = vadd.xlane.f32.xlu1 %v868_v18 }
 0x15d   :  { %866 = vadd.xlane.f32.xlu0 %v865_v6 }
 0x15e   :  { %1090 = vadd.xlane.f32.xlu1 %v1089_v2 }
 0x161   :  { %1045 = vadd.xlane.f32.xlu0 %v1044_v4 }
 0x162   :  { %1093 = vadd.xlane.f32.xlu1 %v1092_v1 }
 0x172   :  { %v780_v18 = vpop.xlane.xlu0 %779 }
 0x173   :  { %v1004_v24 = vpop.xlane.xlu1 %1003  ;;  %v872_v46 = vmax.f32 %v780_v18, 1e-24  ;;  %v1256_v18 = vld [vmem:[%s6556_s3 + $0x8] sm:$0xff] }
 0x174   :  { %v1096_v5 = vmax.f32 %v1004_v24, 1e-24 }
 0x176   :  { %4694 = vrsqrt.f32 %v1096_v5  ;;  %v777_v33 = vpop.xlane.xlu0 %776 }
 0x177   :  { %4696 = vrsqrt.f32 %v872_v46  ;;  %v786_v25 = vpop.xlane.xlu1 %785  ;;  %v871_v63 = vmax.f32 %v777_v33, 1e-24 }
 0x178   :  { %v874_v31 = vmax.f32 %v786_v25, 1e-24 }
 0x17a   :  { %4698 = vrsqrt.f32 %v874_v31  ;;  %v1001_v6 = vpop.xlane.xlu0 %1000  ;;  %v1192_v31 = vld [vmem:[%s6555_s2 + $0x8] sm:$0xff] }
 0x17b   :  { %4700 = vrsqrt.f32 %v871_v63  ;;  %v1010_v2 = vpop.xlane.xlu1 %1009  ;;  %v1095_v27 = vmax.f32 %v1001_v6, 1e-24 }
 0x17c   :  { %v1098_v45 = vmax.f32 %v1010_v2, 1e-24 }
 0x17e   :  { %4702 = vrsqrt.f32 %v1098_v45  ;;  %v1007_v1 = vpop.xlane.xlu0 %1006 }
 0x17f   :  { %4704 = vrsqrt.f32 %v1095_v27  ;;  %v783_v32 = vpop.xlane.xlu1 %782  ;;  %v1097_v24 = vmax.f32 %v1007_v1, 1e-24 }
 0x180   :  { %v4695_v4 = vpop.eup %4694  ;;  %v873_v47 = vmax.f32 %v783_v32, 1e-24 }
 0x181   :  { %v4697_v5 = vpop.eup %4696  ;;  %v1160_v33 = vmul.f32 %v4695_v4, %v5161_v10 }
 0x182   :  { %4706 = vrsqrt.f32 %v873_v47  ;;  %v936_v45 = vmul.f32 %v4697_v5, %v5158_v9  ;;  %v1016_v46 = vpop.xlane.xlu0 %1015  ;;  %v1194_v9 = vld [vmem:[%s6555_s2 + $0x18] sm:$0xff] }
 0x183   :  { %4708 = vrsqrt.f32 %v1097_v24  ;;  %v792_v63 = vpop.xlane.xlu1 %791  ;;  %v1288_v25 = vmul.f32 %v1256_v18, %v1160_v33  ;;  %v1100_v27 = vmax.f32 %v1016_v46, 1e-24  ;;  %v1258_v24 = vld [vmem:[%s6556_s3 + $0x18] sm:$0xff] }
 0x184   :  { %v4699_v2 = vpop.eup %4698  ;;  %v876_v6 = vmax.f32 %v792_v63, 1e-24  ;;  %v1224_v32 = vmul.f32 %v1192_v31, %v936_v45 }
 0x185   :  { %v4701_v1 = vpop.eup %4700  ;;  %v938_v42 = vmul.f32 %v4699_v2, %v5176_v20  ;;  %v1191_v20 = vld [vmem:[%s6555_s2] sm:$0xff] }
 0x186   :  { %4710 = vrsqrt.f32 %v876_v6  ;;  %v1320_v51 = vsub.f32 %v1224_v32, %v1288_v25  ;;  %v789_v4 = vpop.xlane.xlu0 %788  ;;  %v935_v18 = vmul.f32 %v4701_v1, %v5164_v13  ;;  %v1193_v32 = vld [vmem:[%s6555_s2 + $0x10] sm:$0xff] }
 0x187   :  { %4712 = vrsqrt.f32 %v1100_v27  ;;  %v798_v10 = vpop.xlane.xlu1 %797  ;;  %v875_v47 = vmax.f32 %v789_v4, 1e-24  ;;  %v1226_v25 = vmul.f32 %v1194_v9, %v938_v42 }
 0x188   :  { %v4703_v44 = vpop.eup %4702  ;;  %v1352_v61 = vand.u32 2147483647, %v1320_v51  ;;  %v1255_v51 = vld [vmem:[%s6556_s3] sm:$0xff]  ;;  %v878_v31 = vmax.f32 %v798_v10, 1e-24  ;;  %v1223_v6 = vmul.f32 %v1191_v20, %v935_v18 }
 0x189   :  { %v4705_v5 = vpop.eup %4704  ;;  %v1162_v33 = vmul.f32 %v4703_v44, %v5181_v23  ;;  %4714 = vrsqrt.f32 %v875_v47 }
 0x18a   :  { %v1386_v45 = vsel %vm774_vm1, %v1352_v61, 0.0  ;;  %v1159_v63 = vmul.f32 %v4705_v5, %v5167_v14  ;;  %v1013_v13 = vpop.xlane.xlu0 %1012  ;;  %v1257_v14 = vld [vmem:[%s6556_s3 + $0x10] sm:$0xff]  ;;  %4716 = vrsqrt.f32 %v878_v31 }
 0x18b   :  { %1387 = vadd.xlane.f32.xlu1 %v1386_v45  ;;  %v804_v46 = vpop.xlane.xlu1 %803  ;;  %v1290_v2 = vmul.f32 %v1258_v24, %v1162_v33  ;;  %v1099_v44 = vmax.f32 %v1013_v13, 1e-24 }
 0x18c   :  { %v4707_v23 = vpop.eup %4706  ;;  %v1287_v27 = vmul.f32 %v1255_v51, %v1159_v63 }
 0x18d   :  { %v4709_v1 = vpop.eup %4708  ;;  %v1322_v10 = vsub.f32 %v1226_v25, %v1290_v2  ;;  %v937_v61 = vmul.f32 %v4707_v23, %v5184_v26  ;;  %4718 = vrsqrt.f32 %v1099_v44  ;;  %v1196_v26 = vld [vmem:[%s6555_s2 + $0x28] sm:$0xff] }
 0x18e   :  { %v1319_v4 = vsub.f32 %v1223_v6, %v1287_v27  ;;  %v1161_v42 = vmul.f32 %v4709_v1, %v5191_v29  ;;  %v1022_v9 = vpop.xlane.xlu0 %1021  ;;  %v1260_v29 = vld [vmem:[%s6556_s3 + $0x28] sm:$0xff] }
 0x18f   :  { %v5592_v47 = vpop.xlane.xlu1 %809  ;;  %v1354_v24 = vand.u32 2147483647, %v1322_v10  ;;  %v1225_v18 = vmul.f32 %v1193_v32, %v937_v61  ;;  %v1102_v33 = vmax.f32 %v1022_v9, 1e-24  ;;  %v880_v10 = vmax.f32 %v804_v46, 1e-24 }
 0x190   :  { %v4711_v5 = vpop.eup %4710  ;;  %v1351_v20 = vand.u32 2147483647, %v1319_v4  ;;  %v1289_v51 = vmul.f32 %v1257_v14, %v1161_v42  ;;  %v1259_v46 = vld [vmem:[%s6556_s3 + $0x20] sm:$0xff] }
 0x191   :  { %v4713_v45 = vpop.eup %4712  ;;  %v1392_v31 = vsel %vm774_vm1, %v1354_v24, 0.0  ;;  %v940_v63 = vmul.f32 %v4711_v5, %v5205_v41  ;;  %4720 = vrsqrt.f32 %v1102_v33  ;;  %v1195_v33 = vld [vmem:[%s6555_s2 + $0x20] sm:$0xff] }
 0x192   :  { %1393 = vadd.xlane.f32.xlu1 %v1392_v31  ;;  %v1383_v13 = vsel %vm774_vm1, %v1351_v20, 0.0  ;;  %v1321_v25 = vsub.f32 %v1225_v18, %v1289_v51  ;;  %v1164_v2 = vmul.f32 %v4713_v45, %v5202_v40  ;;  %v795_v44 = vpop.xlane.xlu0 %794 }
 0x193   :  { %1384 = vadd.xlane.f32.xlu0 %v1383_v13  ;;  %v5604_v23 = vpop.xlane.xlu1 %815  ;;  %v1228_v6 = vmul.f32 %v1196_v26, %v940_v63  ;;  %v877_v27 = vmax.f32 %v795_v44, 1e-24  ;;  %v4715_v41 = vpop.eup %4714 }
 0x194   :  { %v1353_v32 = vand.u32 2147483647, %v1321_v25  ;;  %v1292_v1 = vmul.f32 %v1260_v29, %v1164_v2  ;;  %v4717_v40 = vpop.eup %4716  ;;  %v939_v18 = vmul.f32 %v4715_v41, %v5213_v48  ;;  %v1198_v25 = vld [vmem:[%s6555_s2 + $0x38] sm:$0xff] }
 0x195   :  { %4722 = vrsqrt.f32 %v877_v27  ;;  %v942_v29 = vmul.f32 %v4717_v40, %v5217_v50  ;;  %v1262_v2 = vld [vmem:[%s6556_s3 + $0x38] sm:$0xff] }
 0x196   :  { %v1389_v61 = vsel %vm774_vm1, %v1353_v32, 0.0  ;;  %v1324_v14 = vsub.f32 %v1228_v6, %v1292_v1  ;;  %v1019_v42 = vpop.xlane.xlu0 %1018  ;;  %4724 = vrsqrt.f32 %v880_v10  ;;  %v1227_v31 = vmul.f32 %v1195_v33, %v939_v18 }
 0x197   :  { %1390 = vadd.xlane.f32.xlu0 %v1389_v61  ;;  %v5607_v4 = vpop.xlane.xlu1 %821  ;;  %v1101_v9 = vmax.f32 %v1019_v42, 1e-24  ;;  %v4719_v5 = vpop.eup %4718  ;;  %v1230_v41 = vmul.f32 %v1198_v25, %v942_v29  ;;  %v882_v61 = vmax.f32 %v5592_v47, 1e-24  ;;  %v1261_v47 = vld [vmem:[%s6556_s3 + $0x30] sm:$0xff]  ;;  %v1200_v25 = vld [vmem:[%s6555_s2 + $0x48] sm:$0xff] }
 0x198   :  { %v1356_v24 = vand.u32 2147483647, %v1324_v14  ;;  %v1163_v51 = vmul.f32 %v4719_v5, %v5239_v0 }
 0x199   :  { %4726 = vrsqrt.f32 %v1101_v9 }
 0x19a   :  { %v1398_v20 = vsel %vm774_vm1, %v1356_v24, 0.0  ;;  %v1028_v45 = vpop.xlane.xlu0 %1027  ;;  %v1291_v63 = vmul.f32 %v1259_v46, %v1163_v51  ;;  %v1197_v46 = vld [vmem:[%s6555_s2 + $0x30] sm:$0xff] }
 0x19b   :  { %1399 = vadd.xlane.f32.xlu1 %v1398_v20  ;;  %v5618_v26 = vpop.xlane.xlu1 %827  ;;  %v1104_v48 = vmax.f32 %v1028_v45, 1e-24  ;;  %v4721_v13 = vpop.eup %4720 }
 0x19c   :  { %v1323_v0 = vsub.f32 %v1227_v31, %v1291_v63  ;;  %v1166_v44 = vmul.f32 %v4721_v13, %v5246_v3 }
 0x19d   :  { %4728 = vrsqrt.f32 %v1104_v48 }
 0x19e   :  { %v801_v27 = vpop.xlane.xlu0 %800  ;;  %v1355_v1 = vand.u32 2147483647, %v1323_v0  ;;  %v1294_v50 = vmul.f32 %v1262_v2, %v1166_v44  ;;  %v1264_v2 = vld [vmem:[%s6556_s3 + $0x48] sm:$0xff] }
 0x19f   :  { %v5628_v6 = vpop.xlane.xlu1 %1051  ;;  %v879_v32 = vmax.f32 %v801_v27, 1e-24  ;;  %v4723_v10 = vpop.eup %4722 }
 0x1a0   :  { %v1395_v14 = vsel %vm774_vm1, %v1355_v1, 0.0  ;;  %v1326_v42 = vsub.f32 %v1230_v41, %v1294_v50  ;;  %v4725_v3 = vpop.eup %4724  ;;  %v941_v5 = vmul.f32 %v4723_v10, %v5261_v19 }
 0x1a1   :  { %4730 = vrsqrt.f32 %v879_v32  ;;  %1396 = vadd.xlane.f32.xlu0 %v1395_v14  ;;  %v944_v19 = vmul.f32 %v4725_v3, %v5232_v60 }
 0x1a2   :  { %v1025_v9 = vpop.xlane.xlu0 %1024  ;;  %v1358_v18 = vand.u32 2147483647, %v1326_v42  ;;  %4732 = vrsqrt.f32 %v882_v61  ;;  %v1229_v63 = vmul.f32 %v1197_v46, %v941_v5  ;;  %v884_v61 = vmax.f32 %v5604_v23, 1e-24  ;;  %v1199_v46 = vld [vmem:[%s6555_s2 + $0x40] sm:$0xff] }
 0x1a3   :  { %v5632_v40 = vpop.xlane.xlu1 %833  ;;  %v1103_v24 = vmax.f32 %v1025_v9, 1e-24  ;;  %v4727_v33 = vpop.eup %4726  ;;  %v1232_v41 = vmul.f32 %v1200_v25, %v944_v19  ;;  %v1263_v23 = vld [vmem:[%s6556_s3 + $0x40] sm:$0xff]  ;;  %v1266_v25 = vld [vmem:[%s6556_s3 + $0x58] sm:$0xff] }
 0x1a4   :  { %v1404_v20 = vsel %vm774_vm1, %v1358_v18, 0.0  ;;  %v1165_v51 = vmul.f32 %v4727_v33, %v5298_v49  ;;  %v4846_v49 = vmov 0  }
 0x1a5   :  { %4734 = vrsqrt.f32 %v1103_v24  ;;  %1405 = vadd.xlane.f32.xlu1 %v1404_v20  ;;  %4693 = vset.pattern.permute.xlu0 %v4846_v49 }
 0x1a6   :  { %v1034_v48 = vpop.xlane.xlu0 %1033  ;;  %v1293_v29 = vmul.f32 %v1261_v47, %v1165_v51  ;;  %4692 = vset.pattern.permute.xlu1 %v4846_v49 }
 0x1a7   :  { %v5643_v45 = vpop.xlane.xlu1 %1057  ;;  %v1106_v31 = vmax.f32 %v1034_v48, 1e-24  ;;  %v4729_v13 = vpop.eup %4728 }
 0x1a8   :  { %v1325_v0 = vsub.f32 %v1229_v63, %v1293_v29  ;;  %v1168_v44 = vmul.f32 %v4729_v13, %v5301_v53  ;;  %v1202_v13 = vld [vmem:[%s6555_s2 + $0x58] sm:$0xff] }
 0x1a9   :  { %4736 = vrsqrt.f32 %v1106_v31 }
 0x1aa   :  { %v807_v27 = vpop.xlane.xlu0 %806  ;;  %v1357_v1 = vand.u32 2147483647, %v1325_v0  ;;  %v1296_v50 = vmul.f32 %v1264_v2, %v1168_v44  ;;  %v6600_v2 = vld [vmem:[#allocation11_spill] sm:$0xff] }
 0x1ab   :  { %v5653_v60 = vpop.xlane.xlu1 %839  ;;  %v881_v32 = vmax.f32 %v807_v27, 1e-24  ;;  %v4731_v10 = vpop.eup %4730 }
 0x1ac   :  { %v1401_v14 = vsel %vm774_vm1, %v1357_v1, 0.0  ;;  %v1328_v42 = vsub.f32 %v1232_v41, %v1296_v50  ;;  %v4733_v53 = vpop.eup %4732  ;;  %v943_v5 = vmul.f32 %v4731_v10, %v5320_v12 }
 0x1ad   :  { %4738 = vrsqrt.f32 %v881_v32  ;;  %1402 = vadd.xlane.f32.xlu0 %v1401_v14  ;;  %v946_v63 = vmul.f32 %v4733_v53, %v5251_v7 }
 0x1ae   :  { %v1031_v3 = vpop.xlane.xlu0 %1030  ;;  %v1360_v18 = vand.u32 2147483647, %v1328_v42  ;;  %4740 = vrsqrt.f32 %v884_v61  ;;  %v1231_v19 = vmul.f32 %v1199_v46, %v943_v5  ;;  %v1265_v46 = vld [vmem:[%s6556_s3 + $0x50] sm:$0xff] }
 0x1af   :  { %v5657_v9 = vpop.xlane.xlu1 %1063  ;;  %v1105_v24 = vmax.f32 %v1031_v3, 1e-24  ;;  %v4735_v33 = vpop.eup %4734  ;;  %v1234_v1 = vmul.f32 %v1202_v13, %v946_v63 }
 0x1b0   :  { %v1410_v47 = vsel %vm774_vm1, %v1360_v18, 0.0  ;;  %v1167_v20 = vmul.f32 %v4735_v33, %v5354_v59  ;;  %v1201_v33 = vld [vmem:[%s6555_s2 + $0x50] sm:$0xff] }
 0x1b1   :  { %4742 = vrsqrt.f32 %v1105_v24  ;;  %1411 = vadd.xlane.f32.xlu1 %v1410_v47  ;;  %v6601_v24 = vld [vmem:[#allocation15_spill] sm:$0xff]  ;;  %v6602_v47 = vld [vmem:[#allocation20_spill] sm:$0xff] }
 0x1b2   :  { %v1040_v48 = vpop.xlane.xlu0 %1039  ;;  %v1295_v31 = vmul.f32 %v1263_v23, %v1167_v20 }
 0x1b3   :  { %v5668_v51 = vpop.xlane.xlu1 %1060  ;;  %v1108_v12 = vmax.f32 %v1040_v48, 1e-24  ;;  %v4737_v29 = vpop.eup %4736 }
 0x1b4   :  { %v1327_v59 = vsub.f32 %v1231_v19, %v1295_v31  ;;  %v1170_v49 = vmul.f32 %v4737_v29, %v6600_v2  ;;  %v6603_v29 = vld [vmem:[#allocation5_spill] sm:$0xff] }
 0x1b5   :  { %4744 = vrsqrt.f32 %v1108_v12  ;;  %v1268_v2 = vld [vmem:[%s6556_s3 + $0x68] sm:$0xff] }
 0x1b6   :  { %v813_v44 = vpop.xlane.xlu0 %812  ;;  %v1359_v32 = vand.u32 2147483647, %v1327_v59  ;;  %v1298_v7 = vmul.f32 %v1266_v25, %v1170_v49  ;;  %v1204_v59 = vld [vmem:[%s6555_s2 + $0x68] sm:$0xff] }
 0x1b7   :  { %v5678_v0 = vpop.xlane.xlu1 %845  ;;  %v883_v27 = vmax.f32 %v813_v44, 1e-24  ;;  %v4739_v41 = vpop.eup %4738 }
 0x1b8   :  { %v1407_v50 = vsel %vm774_vm1, %v1359_v32, 0.0  ;;  %v1330_v10 = vsub.f32 %v1234_v1, %v1298_v7  ;;  %v4741_v42 = vpop.eup %4740  ;;  %v945_v18 = vmul.f32 %v4739_v41, %v6601_v24 }
 0x1b9   :  { %4746 = vrsqrt.f32 %v883_v27  ;;  %1408 = vadd.xlane.f32.xlu0 %v1407_v50  ;;  %v948_v13 = vmul.f32 %v4741_v42, %v6603_v29 }
 0x1ba   :  { %v1037_v14 = vpop.xlane.xlu0 %1036  ;;  %v1362_v53 = vand.u32 2147483647, %v1330_v10  ;;  %v1233_v31 = vmul.f32 %v1201_v33, %v945_v18  ;;  %v1203_v33 = vld [vmem:[%s6555_s2 + $0x60] sm:$0xff] }
 0x1bb   :  { %v5681_v61 = vpop.xlane.xlu1 %1069  ;;  %v1107_v3 = vmax.f32 %v1037_v14, 1e-24  ;;  %v4743_v5 = vpop.eup %4742  ;;  %v1236_v41 = vmul.f32 %v1204_v59, %v948_v13 }
 0x1bc   :  { %v1416_v23 = vsel %vm774_vm1, %v1362_v53, 0.0  ;;  %v1169_v20 = vmul.f32 %v4743_v5, %v6602_v47 }
 0x1bd   :  { %4748 = vrsqrt.f32 %v1107_v3  ;;  %1417 = vadd.xlane.f32.xlu1 %v1416_v23 }
 0x1be   :  { %v819_v12 = vpop.xlane.xlu0 %818  ;;  %v1297_v63 = vmul.f32 %v1265_v46, %v1169_v20  ;;  %v1267_v46 = vld [vmem:[%s6556_s3 + $0x60] sm:$0xff] }
 0x1bf   :  { %v5692_v48 = vpop.xlane.xlu1 %1066  ;;  %v885_v19 = vmax.f32 %v819_v12, 1e-24  ;;  %v4745_v25 = vpop.eup %4744 }
 0x1c0   :  { %v1329_v49 = vsub.f32 %v1233_v31, %v1297_v63  ;;  %v1172_v44 = vmul.f32 %v4745_v25, %v5258_v17 }
 0x1c1   :  { %4750 = vrsqrt.f32 %v885_v19 }
 0x1c2   :  { %v1043_v32 = vpop.xlane.xlu0 %1042  ;;  %v1361_v7 = vand.u32 2147483647, %v1329_v49  ;;  %v1300_v50 = vmul.f32 %v1268_v2, %v1172_v44 }
 0x1c3   :  { %v5702_v27 = vpop.xlane.xlu1 %851  ;;  %v1109_v1 = vmax.f32 %v1043_v32, 1e-24  ;;  %v4747_v10 = vpop.eup %4746  ;;  %v1269_v32 = vld [vmem:[%s6556_s3 + $0x70] sm:$0xff] }
 0x1c4   :  { %v1413_v14 = vsel %vm774_vm1, %v1361_v7, 0.0  ;;  %v1332_v42 = vsub.f32 %v1236_v41, %v1300_v50  ;;  %v947_v17 = vmul.f32 %v4747_v10, %v5264_v21 }
 0x1c5   :  { %4752 = vrsqrt.f32 %v1109_v1  ;;  %1414 = vadd.xlane.f32.xlu0 %v1413_v14  ;;  %v1115_v1 = vmax.f32 %v5668_v51, 1e-24 }
 0x1c6   :  { %v825_v53 = vpop.xlane.xlu0 %824  ;;  %v1364_v18 = vand.u32 2147483647, %v1332_v42  ;;  %v1235_v31 = vmul.f32 %v1203_v33, %v947_v17 }
 0x1c7   :  { %v5705_v3 = vpop.xlane.xlu1 %1075  ;;  %v887_v24 = vmax.f32 %v825_v53, 1e-24  ;;  %v4749_v5 = vpop.eup %4748 }
 0x1c8   :  { %v1422_v23 = vsel %vm774_vm1, %v1364_v18, 0.0  ;;  %v1171_v47 = vmul.f32 %v4749_v5, %v5267_v22  ;;  %v1205_v22 = vld [vmem:[%s6555_s2 + $0x70] sm:$0xff] }
 0x1c9   :  { %4754 = vrsqrt.f32 %v887_v24  ;;  %1423 = vadd.xlane.f32.xlu1 %v1422_v23  ;;  %v1117_v24 = vmax.f32 %v5692_v48, 1e-24  ;;  %v1207_v23 = vld [vmem:[%s6555_s2 + $0x80] sm:$0xff] }
 0x1ca   :  { %v1049_v12 = vpop.xlane.xlu0 %1048  ;;  %v1299_v21 = vmul.f32 %v1267_v46, %v1171_v47  ;;  %v1271_v47 = vld [vmem:[%s6556_s3 + $0x80] sm:$0xff] }
 0x1cb   :  { %v1073_v20 = vpop.xlane.xlu1 %1072  ;;  %v1111_v19 = vmax.f32 %v1049_v12, 1e-24  ;;  %v4751_v63 = vpop.eup %4750 }
 0x1cc   :  { %v1331_v29 = vsub.f32 %v1235_v31, %v1299_v21  ;;  %v949_v49 = vmul.f32 %v4751_v63, %v5284_v37  ;;  %v1119_v12 = vmax.f32 %v1073_v20, 1e-24 }
 0x1cd   :  { %4756 = vrsqrt.f32 %v1111_v19 }
 0x1ce   :  { %v831_v25 = vpop.xlane.xlu0 %830  ;;  %v1363_v2 = vand.u32 2147483647, %v1331_v29  ;;  %v1237_v14 = vmul.f32 %v1205_v22, %v949_v49 }
 0x1cf   :  { %v5716_v13 = vpop.xlane.xlu1 %857  ;;  %v889_v59 = vmax.f32 %v831_v25, 1e-24  ;;  %v4753_v44 = vpop.eup %4752 }
 0x1d0   :  { %v1419_v7 = vsel %vm774_vm1, %v1363_v2, 0.0  ;;  %v1173_v41 = vmul.f32 %v4753_v44, %v5287_v38 }
 0x1d1   :  { %4758 = vrsqrt.f32 %v889_v59  ;;  %1420 = vadd.xlane.f32.xlu0 %v1419_v7  ;;  %v886_v7 = vmax.f32 %v5607_v4, 1e-24 }
 0x1d2   :  { %v1055_v37 = vpop.xlane.xlu0 %1054  ;;  %v1301_v42 = vmul.f32 %v1269_v32, %v1173_v41  ;;  %4760 = vrsqrt.f32 %v1115_v1  ;;  %v1209_v41 = vld [vmem:[%s6555_s2 + $0x90] sm:$0xff] }
 0x1d3   :  { %v5728_v50 = vpop.xlane.xlu1 %1081  ;;  %v1113_v10 = vmax.f32 %v1055_v37, 1e-24  ;;  %v4755_v53 = vpop.eup %4754  ;;  %v1273_v37 = vld [vmem:[%s6556_s3 + $0x90] sm:$0xff] }
 0x1d4   :  { %v1333_v18 = vsub.f32 %v1237_v14, %v1301_v42  ;;  %v951_v38 = vmul.f32 %v4755_v53, %v5304_v57 }
 0x1d5   :  { %4762 = vrsqrt.f32 %v1113_v10 }
 0x1d6   :  { %v837_v51 = vpop.xlane.xlu0 %836  ;;  %v1365_v33 = vand.u32 2147483647, %v1333_v18  ;;  %4764 = vrsqrt.f32 %v1117_v24  ;;  %v1239_v63 = vmul.f32 %v1207_v23, %v951_v38  ;;  %v1211_v38 = vld [vmem:[%s6555_s2 + $0xa0] sm:$0xff] }
 0x1d7   :  { %v1079_v17 = vpop.xlane.xlu1 %1078  ;;  %v891_v5 = vmax.f32 %v837_v51, 1e-24  ;;  %v4757_v46 = vpop.eup %4756 }
 0x1d8   :  { %v1425_v48 = vsel %vm774_vm1, %v1365_v33, 0.0  ;;  %v1175_v19 = vmul.f32 %v4757_v46, %v5307_v58  ;;  %v1121_v59 = vmax.f32 %v1079_v17, 1e-24  ;;  %v888_v33 = vmax.f32 %v5618_v26, 1e-24 }
 0x1d9   :  { %4766 = vrsqrt.f32 %v891_v5  ;;  %1426 = vadd.xlane.f32.xlu0 %v1425_v48  ;;  %v1112_v46 = vmax.f32 %v5628_v6, 1e-24 }
 0x1da   :  { %v843_v57 = vpop.xlane.xlu0 %842  ;;  %v1303_v29 = vmul.f32 %v1271_v47, %v1175_v19  ;;  %4768 = vrsqrt.f32 %v1119_v12 }
 0x1db   :  { %v5740_v31 = vpop.xlane.xlu1 %863  ;;  %v893_v21 = vmax.f32 %v843_v57, 1e-24  ;;  %v4759_v25 = vpop.eup %4758 }
 0x1dc   :  { %v1335_v2 = vsub.f32 %v1239_v63, %v1303_v29  ;;  %v4761_v44 = vpop.eup %4760  ;;  %v953_v58 = vmul.f32 %v4759_v25, %v5323_v15  ;;  %v1277_v29 = vld [vmem:[%s6556_s3 + $0xb0] sm:$0xff]  ;;  %v1114_v25 = vmax.f32 %v5643_v45, 1e-24  ;;  %v1279_v45 = vld [vmem:[%s6556_s3 + $0xc0] sm:$0xff] }
 0x1dd   :  { %4770 = vrsqrt.f32 %v893_v21  ;;  %v1179_v53 = vmul.f32 %v4761_v44, %v5340_v36 }
 0x1de   :  { %v849_v20 = vpop.xlane.xlu0 %848  ;;  %v1367_v32 = vand.u32 2147483647, %v1335_v2  ;;  %4772 = vrsqrt.f32 %v1121_v59  ;;  %v1241_v17 = vmul.f32 %v1209_v41, %v953_v58 }
 0x1df   :  { %v5742_v49 = vpop.xlane.xlu1 %1087  ;;  %v895_v22 = vmax.f32 %v849_v20, 1e-24  ;;  %v4763_v1 = vpop.eup %4762 }
 0x1e0   :  { %v1431_v10 = vsel %vm774_vm1, %v1367_v32, 0.0  ;;  %v1177_v14 = vmul.f32 %v4763_v1, %v5326_v16  ;;  %v4765_v4 = vpop.eup %4764  ;;  %v1275_v16 = vld [vmem:[%s6556_s3 + $0xa0] sm:$0xff] }
 0x1e1   :  { %4774 = vrsqrt.f32 %v895_v22  ;;  %1432 = vadd.xlane.f32.xlu0 %v1431_v10  ;;  %v1181_v26 = vmul.f32 %v4765_v4, %v5367_v11  ;;  %v1307_v63 = vmul.f32 %v1275_v16, %v1179_v53  ;;  %v1217_v16 = vld [vmem:[%s6555_s2 + $0xd0] sm:$0xff] }
 0x1e2   :  { %v855_v15 = vpop.xlane.xlu0 %854  ;;  %v1305_v51 = vmul.f32 %v1273_v37, %v1177_v14  ;;  %4776 = vrsqrt.f32 %v886_v7  ;;  %v890_v14 = vmax.f32 %v5632_v40, 1e-24 }
 0x1e3   :  { %v1085_v42 = vpop.xlane.xlu1 %1084  ;;  %v897_v18 = vmax.f32 %v855_v15, 1e-24  ;;  %v4767_v5 = vpop.eup %4766  ;;  %v1309_v22 = vmul.f32 %v1277_v29, %v1181_v26  ;;  %v1219_v29 = vld [vmem:[%s6555_s2 + $0xe0] sm:$0xff] }
 0x1e4   :  { %v1123_v24 = vmax.f32 %v1085_v42, 1e-24  ;;  %v1337_v36 = vsub.f32 %v1241_v17, %v1305_v51  ;;  %v955_v23 = vmul.f32 %v4767_v5, %v5343_v39  ;;  %v4769_v48 = vpop.eup %4768  ;;  %v1213_v39 = vld [vmem:[%s6555_s2 + $0xb0] sm:$0xff] }
 0x1e5   :  { %v1183_v32 = vmul.f32 %v4769_v48, %v5392_v35 }
 0x1e6   :  { %4778 = vrsqrt.f32 %v1123_v24  ;;  %v861_v12 = vpop.xlane.xlu0 %860  ;;  %v1369_v57 = vand.u32 2147483647, %v1337_v36  ;;  %v1243_v21 = vmul.f32 %v1211_v38, %v955_v23  ;;  %v1116_v38 = vmax.f32 %v5657_v9, 1e-24 }
 0x1e7   :  { %4780 = vrsqrt.f32 %v897_v18  ;;  %v5764_v47 = vpop.xlane.xlu1 %869  ;;  %v899_v19 = vmax.f32 %v861_v12, 1e-24  ;;  %v4771_v6 = vpop.eup %4770  ;;  %v1311_v24 = vmul.f32 %v1279_v45, %v1183_v32 }
 0x1e8   :  { %4782 = vrsqrt.f32 %v888_v33  ;;  %v1437_v11 = vsel %vm774_vm1, %v1369_v57, 0.0  ;;  %v1339_v59 = vsub.f32 %v1243_v21, %v1307_v63  ;;  %v957_v2 = vmul.f32 %v4771_v6, %v5370_v56  ;;  %v4773_v58 = vpop.eup %4772  ;;  %v1215_v56 = vld [vmem:[%s6555_s2 + $0xc0] sm:$0xff] }
 0x1e9   :  { %4784 = vrsqrt.f32 %v1112_v46  ;;  %1438 = vadd.xlane.f32.xlu0 %v1437_v11  ;;  %v1185_v5 = vmul.f32 %v4773_v58, %v5415_v55  ;;  %v892_v55 = vmax.f32 %v5653_v60, 1e-24  ;;  %v1118_v63 = vmax.f32 %v5681_v61, 1e-24 }
 0x1ea   :  { %4786 = vrsqrt.f32 %v899_v19  ;;  %v867_v44 = vpop.xlane.xlu0 %866  ;;  %v1371_v41 = vand.u32 2147483647, %v1339_v59  ;;  %v1245_v37 = vmul.f32 %v1213_v39, %v957_v2  ;;  %v894_v60 = vmax.f32 %v5678_v0, 1e-24 }
 0x1eb   :  { %v1091_v20 = vpop.xlane.xlu1 %1090  ;;  %v901_v7 = vmax.f32 %v867_v44, 1e-24  ;;  %v4775_v10 = vpop.eup %4774  ;;  %4788 = vrsqrt.f32 %v1114_v25  ;;  %v1120_v11 = vmax.f32 %v5705_v3, 1e-24  ;;  %v1285_v44 = vld [vmem:[%s6556_s3 + $0xf0] sm:$0xff]  ;;  %v6604_v3 = vld [vmem:[#allocation8_spill] sm:$0xff] }
 0x1ec   :  { %v1125_v1 = vmax.f32 %v1091_v20, 1e-24  ;;  %v1443_v35 = vsel %vm774_vm1, %v1371_v41, 0.0  ;;  %v1341_v42 = vsub.f32 %v1245_v37, %v1309_v22  ;;  %v959_v15 = vmul.f32 %v4775_v10, %v5395_v52  ;;  %v5786_v53 = vpop.eup %4776  ;;  %v1281_v52 = vld [vmem:[%s6556_s3 + $0xd0] sm:$0xff]  ;;  %v1272_v41 = vld [vmem:[%s6556_s3 + $0x88] sm:$0xff] }
 0x1ed   :  { %1444 = vadd.xlane.f32.xlu0 %v1443_v35  ;;  %v1313_v19 = vmul.f32 %v1281_v52, %v1185_v5  ;;  %v896_v0 = vmax.f32 %v5702_v27, 1e-24  ;;  %v1122_v27 = vmax.f32 %v5728_v50, 1e-24  ;;  %v6605_v37 = vld [vmem:[#allocation7_spill] sm:$0xff] }
 0x1ee   :  { %4790 = vrsqrt.f32 %v1125_v1  ;;  %v1046_v4 = vpop.xlane.xlu0 %1045  ;;  %v1373_v40 = vand.u32 2147483647, %v1341_v42  ;;  %v1247_v51 = vmul.f32 %v1215_v56, %v959_v15  ;;  %v6606_v15 = vld [vmem:[#allocation6_spill] sm:$0xff]  ;;  %v1206_v50 = vld [vmem:[%s6555_s2 + $0x78] sm:$0xff] }
 0x1ef   :  { %4792 = vrsqrt.f32 %v901_v7  ;;  %v1110_v17 = vmax.f32 %v1046_v4, 1e-24  ;;  %v1094_v56 = vpop.xlane.xlu1 %1093  ;;  %v950_v4 = vmul.f32 %v5786_v53, %v6606_v15  ;;  %v1124_v53 = vmax.f32 %v5742_v49, 1e-24  ;;  %v1216_v15 = vld [vmem:[%s6555_s2 + $0xc8] sm:$0xff] }
 0x1f0   :  { %v4779_v18 = vpop.eup %4778  ;;  %4794 = vrsqrt.f32 %v890_v14  ;;  %v1449_v46 = vsel %vm774_vm1, %v1373_v40, 0.0  ;;  %v1343_v36 = vsub.f32 %v1247_v51, %v1311_v24  ;;  %v6607_v51 = vld [vmem:[#allocation12_spill] sm:$0xff] }
 0x1f1   :  { %v4781_v33 = vpop.eup %4780  ;;  %4796 = vrsqrt.f32 %v1110_v17  ;;  %1450 = vadd.xlane.f32.xlu0 %v1449_v46  ;;  %v1187_v57 = vmul.f32 %v4779_v18, %v5438_v30  ;;  %v898_v18 = vmax.f32 %v5716_v13, 1e-24  ;;  %v1270_v17 = vld [vmem:[%s6556_s3 + $0x78] sm:$0xff]  ;;  %v1126_v46 = vmax.f32 %v1094_v56, 1e-24  ;;  %v6613_v56 = vld [vmem:[#allocation13_spill] sm:$0xff] }
 0x1f2   :  { %v961_v23 = vmul.f32 %v4781_v33, %v5418_v43  ;;  %v4783_v12 = vpop.eup %4782  ;;  %v1375_v26 = vand.u32 2147483647, %v1343_v36  ;;  %4798 = vrsqrt.f32 %v1116_v38  ;;  %v1283_v43 = vld [vmem:[%s6556_s3 + $0xe0] sm:$0xff]  ;;  %v1274_v13 = vld [vmem:[%s6556_s3 + $0x98] sm:$0xff]  ;;  %v1238_v49 = vmul.f32 %v1206_v50, %v950_v4  ;;  %v6614_v50 = vld [vmem:[#allocation18_spill] sm:$0xff] }
 0x1f3   :  { %v4785_v9 = vpop.eup %4784  ;;  %4800 = vrsqrt.f32 %v892_v55  ;;  %v1315_v20 = vmul.f32 %v1283_v43, %v1187_v57  ;;  %v952_v10 = vmul.f32 %v4783_v12, %v6605_v37  ;;  %v900_v55 = vmax.f32 %v5740_v31, 1e-24  ;;  %v6609_v43 = vld [vmem:[#allocation19_spill] sm:$0xff] }
 0x1f4   :  { %v1249_v48 = vmul.f32 %v1217_v16, %v961_v23  ;;  %v4787_v21 = vpop.eup %4786  ;;  %v1455_v6 = vsel %vm774_vm1, %v1375_v26, 0.0  ;;  %4802 = vrsqrt.f32 %v1118_v63  ;;  %v1176_v45 = vmul.f32 %v4785_v9, %v6604_v3  ;;  %v6608_v23 = vld [vmem:[#allocation9_spill] sm:$0xff] }
 0x1f5   :  { %v963_v39 = vmul.f32 %v4787_v21, %v5441_v8  ;;  %v4789_v30 = vpop.eup %4788  ;;  %1456 = vadd.xlane.f32.xlu0 %v1455_v6  ;;  %v1221_v8 = vld [vmem:[%s6555_s2 + $0xf0] sm:$0xff]  ;;  %4804 = vrsqrt.f32 %v894_v60  ;;  %v1511_v4 = vlaneseq }
 0x1f6   :  { %v1345_v25 = vsub.f32 %v1249_v48, %v1313_v19  ;;  %4806 = vrsqrt.f32 %v1120_v11  ;;  %v1304_v40 = vmul.f32 %v1272_v41, %v1176_v45  ;;  %v1178_v5 = vmul.f32 %v4789_v30, %v6607_v51  ;;  %v6611_v45 = vld [vmem:[#allocation10_spill] sm:$0xff] }
 0x1f7   :  { %v1251_v2 = vmul.f32 %v1219_v29, %v963_v39  ;;  %4808 = vrsqrt.f32 %v896_v0  ;;  %v902_v19 = vmax.f32 %v5764_v47, 1e-24  ;;  %v6610_v47 = vld [vmem:[#allocation16_spill] sm:$0xff] }
 0x1f8   :  { %v4791_v61 = vpop.eup %4790  ;;  %v1377_v59 = vand.u32 2147483647, %v1345_v25  ;;  %4810 = vrsqrt.f32 %v1122_v27  ;;  %v1306_v21 = vmul.f32 %v1274_v13, %v1178_v5  ;;  %v1276_v25 = vld [vmem:[%s6556_s3 + $0xa8] sm:$0xff]  ;;  %v1282_v5 = vld [vmem:[%s6556_s3 + $0xd8] sm:$0xff] }
 0x1f9   :  { %v4793_v22 = vpop.eup %4792  ;;  %v1189_v32 = vmul.f32 %v4791_v61, %v5459_v54  ;;  %v1347_v1 = vsub.f32 %v1251_v2, %v1315_v20  ;;  %4812 = vrsqrt.f32 %v898_v18  ;;  %v1212_v2 = vld [vmem:[%s6555_s2 + $0xa8] sm:$0xff] }
 0x1fa   :  { %v1461_v58 = vsel %vm774_vm1, %v1377_v59, 0.0  ;;  %v965_v7 = vmul.f32 %v4793_v22, %v5456_v28  ;;  %v4795_v14 = vpop.eup %4794  ;;  %v1208_v28 = vld [vmem:[%s6555_s2 + $0x88] sm:$0xff]  ;;  %4814 = vrsqrt.f32 %v1124_v53 }
 0x1fb   :  { %1462 = vadd.xlane.f32.xlu0 %v1461_v58  ;;  %v1317_v54 = vmul.f32 %v1285_v44, %v1189_v32  ;;  %v1379_v35 = vand.u32 2147483647, %v1347_v1  ;;  %v4797_v24 = vpop.eup %4796  ;;  %v1240_v36 = vmul.f32 %v1208_v28, %v952_v10  ;;  %v954_v12 = vmul.f32 %v4795_v14, %v6608_v23  ;;  %v6612_v1 = vld [vmem:[#allocation14_spill] sm:$0xff]  ;;  %v6615_v13 = vld [vmem:[#allocation17_spill] sm:$0xff] }
 0x1fc   :  { %v1253_v42 = vmul.f32 %v1221_v8, %v965_v7  ;;  %v1174_v16 = vmul.f32 %v4797_v24, %v5279_v34  ;;  %v4799_v52 = vpop.eup %4798  ;;  %v1210_v34 = vld [vmem:[%s6555_s2 + $0x98] sm:$0xff]  ;;  %4816 = vrsqrt.f32 %v1126_v46  ;;  %v6616_v23 = vld [vmem:[#allocation22_spill] sm:$0xff] }
 0x1fd   :  { %v1467_v33 = vsel %vm774_vm1, %v1379_v35, 0.0  ;;  %v4801_v48 = vpop.eup %4800  ;;  %v1336_v57 = vsub.f32 %v1240_v36, %v1304_v40  ;;  %v1180_v60 = vmul.f32 %v4799_v52, %v6609_v43  ;;  %v1242_v6 = vmul.f32 %v1210_v34, %v954_v12  ;;  %v1278_v8 = vld [vmem:[%s6556_s3 + $0xb8] sm:$0xff] }
 0x1fe   :  { %v1349_v38 = vsub.f32 %v1253_v42, %v1317_v54  ;;  %v1302_v26 = vmul.f32 %v1270_v17, %v1174_v16  ;;  %v4803_v31 = vpop.eup %4802  ;;  %4818 = vrsqrt.f32 %v900_v55  ;;  %v956_v11 = vmul.f32 %v4801_v48, %v6610_v47  ;;  %v1214_v54 = vld [vmem:[%s6555_s2 + $0xb8] sm:$0xff] }
 0x1ff   :  { %1468 = vadd.xlane.f32.xlu0 %v1467_v33  ;;  %v4805_v39 = vpop.eup %4804  ;;  %4820 = vrsqrt.f32 %v902_v19  ;;  %v1338_v59 = vsub.f32 %v1242_v6, %v1306_v21  ;;  %v1368_v44 = vand.u32 2147483647, %v1336_v57  ;;  %v1308_v22 = vmul.f32 %v1276_v25, %v1180_v60  ;;  %v1218_v36 = vld [vmem:[%s6555_s2 + $0xd8] sm:$0xff]  ;;  %v6618_v21 = vld [vmem:[#allocation21_spill] sm:$0xff] }
 0x200   :  { %v1381_v9 = vand.u32 2147483647, %v1349_v38  ;;  %v1334_v29 = vsub.f32 %v1238_v49, %v1302_v26  ;;  %v4807_v61 = vpop.eup %4806  ;;  %v1182_v0 = vmul.f32 %v4803_v31, %v5360_v62  ;;  %v1244_v3 = vmul.f32 %v1212_v2, %v956_v11  ;;  %v1280_v62 = vld [vmem:[%s6556_s3 + $0xc8] sm:$0xff]  ;;  %v6617_v34 = vld [vmem:[#allocation24_spill] sm:$0xff]  ;;  %v6619_v25 = vld [vmem:[#allocation23_spill] sm:$0xff] }
 0x201   :  { %v4809_v32 = vpop.eup %4808  ;;  %v958_v58 = vmul.f32 %v4805_v39, %v6611_v45  ;;  %v1184_v7 = vmul.f32 %v4807_v61, %v6612_v1  ;;  %v1370_v27 = vand.u32 2147483647, %v1338_v59  ;;  %v1434_v37 = vsel %vm774_vm1, %v1368_v44, 0.0  ;;  %v1284_v26 = vld [vmem:[%s6556_s3 + $0xe8] sm:$0xff]  ;;  %v1222_v47 = vld [vmem:[%s6555_s2 + $0xf8] sm:$0xff] }
 0x202   :  { %v1473_v63 = vsel %vm774_vm1, %v1381_v9, 0.0  ;;  %v1366_v30 = vand.u32 2147483647, %v1334_v29  ;;  %v4811_v41 = vpop.eup %4810  ;;  %v1340_v10 = vsub.f32 %v1244_v3, %v1308_v22  ;;  %v1310_v14 = vmul.f32 %v1278_v8, %v1182_v0  ;;  %v1286_v29 = vld [vmem:[%s6556_s3 + $0xf8] sm:$0xff]  ;;  %v1220_v6 = vld [vmem:[%s6555_s2 + $0xe8] sm:$0xff]  ;;  %s4848_s2 = smov [#allocation2]  }
 0x203   :  { %1474 = vadd.xlane.f32.xlu0 %v1473_v63  ;;  %v960_v35 = vmul.f32 %v4809_v32, %v6613_v56  ;;  %v4813_v42 = vpop.eup %4812  ;;  %v1246_v24 = vmul.f32 %v1214_v54, %v958_v58  ;;  %v1312_v18 = vmul.f32 %v1280_v62, %v1184_v7  ;;  %v1186_v17 = vmul.f32 %v4811_v41, %v6614_v50  ;;  %s4416_s3 = sshll.u32 %s4848_s2, 4  ;;  %s4417_s3 = int_to_ptr.vmem [resolvable:$true] %s4416_s3 }
 0x204   :  { %v1428_v20 = vsel %vm774_vm1, %v1366_v30, 0.0  ;;  %v4815_v28 = vpop.eup %4814  ;;  %v1440_v51 = vsel %vm774_vm1, %v1370_v27, 0.0  ;;  %v1372_v33 = vand.u32 2147483647, %v1340_v10  ;;  %v962_v52 = vmul.f32 %v4813_v42, %v6615_v13  ;;  %s4822_s22 = scalar_lea.vmem %s4417_s3, 32  ;;  %p4827_p1 = scmp.lt.s32.totalorder %s4417_s3, %s4417_s3 }
 0x205   :  { %1429 = vadd.xlane.f32.xlu1 %v1428_v20  ;;  %v1342_v38 = vsub.f32 %v1246_v24, %v1310_v14  ;;  %v1248_v16 = vmul.f32 %v1216_v15, %v960_v35  ;;  %v1188_v12 = vmul.f32 %v4815_v28, %v6616_v23  ;;  %v5890_v55 = vshrl.u32 %v1511_v4, 7  ;;  %p4823_p0 = scmp.ne.s32.totalorder %s4417_s3, %s4822_s22  ;;  %p4828_p2 = scmp.lt.s32.totalorder %s4822_s22, %s4822_s22 }
 0x206   :  { %v4817_v40 = vpop.eup %4816  ;;  %v1314_v49 = vmul.f32 %v1282_v5, %v1186_v17  ;;  %v4847_v19 = vmov 1966171168   ;;  %v1446_v43 = vsel %vm774_vm1, %v1372_v33, 0.0  ;;  %v1250_v31 = vmul.f32 %v1218_v36, %v962_v52 }
 0x207   :  { %v1344_v9 = vsub.f32 %v1248_v16, %v1312_v18  ;;  %v1190_v48 = vmul.f32 %v4817_v40, %v6617_v34  ;;  %v2540_v57 = vunpack.c.l.s4 %v4847_v19  ;;  %v1374_v60 = vand.u32 2147483647, %v1342_v38  ;;  %p4829_p3 = por %p4828_p2, %p4827_p1 }
 0x208   :  { %v4819_v53 = vpop.eup %4818  ;;  %v1316_v30 = vmul.f32 %v1284_v26, %v1188_v12  ;;  %v5909_v11 = vsub.s32 0, %v5890_v55  ;;  %v5912_v61 = vsub.s32 1, %v5890_v55  ;;  %v5915_v59 = vsub.s32 2, %v5890_v55 }
 0x209   :  { %1435 = vadd.xlane.f32.xlu1 %v1434_v37  ;;  %v4821_v46 = vpop.eup %4820  ;;  %v964_v63 = vmul.f32 %v4819_v53, %v6618_v21  ;;  %v1376_v2 = vand.u32 2147483647, %v1344_v9  ;;  %v1346_v20 = vsub.f32 %v1250_v31, %v1314_v49  ;;  %v1318_v44 = vmul.f32 %v1286_v29, %v1190_v48  ;;  %p4830_p4 = pnand %p4829_p3, %p4823_p0 }
 0x20a   :  { %v966_v39 = vmul.f32 %v4821_v46, %v6619_v25  ;;  %v2541_v22 = vunpack.c.0.s8 %v2540_v57  ;;  %v5918_v32 = vsub.s32 3, %v5890_v55  ;;  %v5921_v8 = vsub.s32 4, %v5890_v55 }
 0x20b   :  { %v1252_v0 = vmul.f32 %v1220_v6, %v964_v63  ;;  %v5924_v3 = vsub.s32 5, %v5890_v55  ;;  %v1452_v45 = vsel %vm774_vm1, %v1374_v60, 0.0  ;;  %v5928_v1 = vsub.s32 6, %v5890_v55 }
 0x20c   :  { %v1254_v58 = vmul.f32 %v1222_v47, %v966_v39  ;;  %v5931_v7 = vsub.s32 7, %v5890_v55  ;;  %v1458_v54 = vsel %vm774_vm1, %v1376_v2, 0.0  ;;  %v1378_v62 = vand.u32 2147483647, %v1346_v20 }
 0x20d   :  { %1441 = vadd.xlane.f32.xlu1 %v1440_v51  ;;  %v1348_v41 = vsub.f32 %v1252_v0, %v1316_v30  ;;  %v5935_v10 = vsub.s32 %v2541_v22, %v5890_v55 }
 0x20e   :  { %v1350_v37 = vsub.f32 %v1254_v58, %v1318_v44  ;;  %v1464_v16 = vsel %vm774_vm1, %v1378_v62, 0.0 }
 0x20f   :  { %v1380_v50 = vand.u32 2147483647, %v1348_v41 }
 0x210   :  { %v1382_v51 = vand.u32 2147483647, %v1350_v37 }
 0x211   :  { %1447 = vadd.xlane.f32.xlu1 %v1446_v43  ;;  %v1470_v36 = vsel %vm774_vm1, %v1380_v50, 0.0 }
 0x212   :  { %v1476_v9 = vsel %vm774_vm1, %v1382_v51, 0.0  ;;  %vm4407_vm1 = vcmp.lt.s32.totalorder %v1511_v4, 256 }
 0x215   :  { %1453 = vadd.xlane.f32.xlu1 %v1452_v45 }
 0x218   :  { %v1388_v27 = vpop.xlane.xlu1 %1387 }
 0x219   :  { %v1546_v14 = vrot.slane %v1388_v27, %v5909_v11  ;;  %v1550_v56 = vrot.slane %v1388_v27, %v5912_v61  ;;  %v1554_v35 = vrot.slane %v1388_v27, %v5915_v59  ;;  %v1558_v42 = vrot.slane %v1388_v27, %v5918_v32  ;;  %1459 = vadd.xlane.f32.xlu1 %v1458_v54 }
 0x21a   :  { %v1562_v15 = vrot.slane %v1388_v27, %v5921_v8  ;;  %v1566_v28 = vrot.slane %v1388_v27, %v5924_v3  ;;  %v1570_v24 = vrot.slane %v1388_v27, %v5928_v1  ;;  %v1574_v18 = vrot.slane %v1388_v27, %v5931_v7 }
 0x21b   :  { %v2584_v17 = vcombine.low %v1546_v14, %v1550_v56  ;;  %v2585_v40 = vcombine.low %v1554_v35, %v1558_v42 }
 0x21c   :  { %v2586_v5 = vcombine.low %v1562_v15, %v1566_v28  ;;  %v2587_v53 = vcombine.low %v1570_v24, %v1574_v18 }
 0x21d   :  { %v2594_v33 = vrot.slane %v2584_v17, %v5935_v10  ;;  %v2601_v38 = vrot.slane %v2585_v40, %v5935_v10  ;;  %1465 = vadd.xlane.f32.xlu1 %v1464_v16 }
 0x21e   :  { %v2608_v13 = vrot.slane %v2586_v5, %v5935_v10  ;;  %v2615_v52 = vrot.slane %v2587_v53, %v5935_v10 }
 0x21f   :  { %v1394_v46 = vpop.xlane.xlu1 %1393  ;;  %v5951_v23 = vcombine.low %v2594_v33, %v2601_v38 }
 0x220   :  { %v1385_v12 = vpop.xlane.xlu0 %1384  ;;  %v5954_v49 = vcombine.low %v2608_v13, %v2615_v52  ;;  %v1610_v26 = vrot.slane %v1394_v46, %v5909_v11  ;;  %v1614_v34 = vrot.slane %v1394_v46, %v5912_v61  ;;  %v1618_v39 = vrot.slane %v1394_v46, %v5915_v59 }
 0x221   :  { %v1514_v48 = vrot.slane %v1385_v12, %v5909_v11  ;;  %v1518_v19 = vrot.slane %v1385_v12, %v5912_v61  ;;  %v1522_v57 = vrot.slane %v1385_v12, %v5915_v59  ;;  %v1526_v21 = vrot.slane %v1385_v12, %v5918_v32  ;;  %1471 = vadd.xlane.f32.xlu1 %v1470_v36 }
 0x222   :  { %v1530_v63 = vrot.slane %v1385_v12, %v5921_v8  ;;  %v1534_v29 = vrot.slane %v1385_v12, %v5924_v3  ;;  %v1538_v43 = vrot.slane %v1385_v12, %v5928_v1  ;;  %v1542_v60 = vrot.slane %v1385_v12, %v5931_v7 }
 0x223   :  { %v2535_v31 = vcombine.low %v1514_v48, %v1518_v19  ;;  %v2536_v6 = vcombine.low %v1522_v57, %v1526_v21  ;;  %v2624_v25 = vrot.slane %v5951_v23, %v5935_v10  ;;  %v1622_v2 = vrot.slane %v1394_v46, %v5918_v32 }
 0x224   :  { %v2537_v30 = vcombine.low %v1530_v63, %v1534_v29  ;;  %v2538_v47 = vcombine.low %v1538_v43, %v1542_v60  ;;  %v1626_v20 = vrot.slane %v1394_v46, %v5921_v8  ;;  %v1391_v44 = vpop.xlane.xlu0 %1390  ;;  %v2631_v45 = vrot.slane %v5954_v49, %v5935_v10 }
 0x225   :  { %v2545_v22 = vrot.slane %v2535_v31, %v5935_v10  ;;  %v2552_v0 = vrot.slane %v2536_v6, %v5935_v10  ;;  %v1630_v58 = vrot.slane %v1394_v46, %v5924_v3  ;;  %v1634_v54 = vrot.slane %v1394_v46, %v5928_v1  ;;  %1477 = vadd.xlane.f32.xlu1 %v1476_v9 }
 0x226   :  { %v2559_v41 = vrot.slane %v2537_v30, %v5935_v10  ;;  %v2566_v27 = vrot.slane %v2538_v47, %v5935_v10  ;;  %v1638_v62 = vrot.slane %v1394_v46, %v5931_v7  ;;  %v2682_v14 = vcombine.low %v1610_v26, %v1614_v34 }
 0x227   :  { %v2567_v37 = vcombine.low %v2545_v22, %v2552_v0  ;;  %v2683_v56 = vcombine.low %v1618_v39, %v1622_v2  ;;  %v2684_v35 = vcombine.low %v1626_v20, %v1630_v58  ;;  %v1578_v28 = vrot.slane %v1391_v44, %v5909_v11 }
 0x228   :  { %v2568_v42 = vcombine.low %v2559_v41, %v2566_v27  ;;  %v2685_v15 = vcombine.low %v1634_v54, %v1638_v62  ;;  %v1582_v24 = vrot.slane %v1391_v44, %v5912_v61  ;;  %v2692_v50 = vrot.slane %v2682_v14, %v5935_v10  ;;  %v1400_v51 = vpop.xlane.xlu1 %1399 }
 0x229   :  { %v2575_v18 = vrot.slane %v2567_v37, %v5935_v10  ;;  %v2699_v17 = vrot.slane %v2683_v56, %v5935_v10  ;;  %v2706_v40 = vrot.slane %v2684_v35, %v5935_v10  ;;  %v1586_v33 = vrot.slane %v1391_v44, %v5915_v59 }
 0x22a   :  { %v2582_v5 = vrot.slane %v2568_v42, %v5935_v10  ;;  %v2713_v53 = vrot.slane %v2685_v15, %v5935_v10  ;;  %v1590_v38 = vrot.slane %v1391_v44, %v5918_v32  ;;  %v1594_v13 = vrot.slane %v1391_v44, %v5921_v8 }
 0x22b   :  { %v2714_v16 = vcombine.low %v2692_v50, %v2699_v17  ;;  %v1598_v52 = vrot.slane %v1391_v44, %v5924_v3  ;;  %v1602_v46 = vrot.slane %v1391_v44, %v5928_v1  ;;  %v1606_v12 = vrot.slane %v1391_v44, %v5931_v7 }
 0x22c   :  { %v2583_v36 = vcombine.low %v2575_v18, %v2582_v5  ;;  %v2715_v23 = vcombine.low %v2706_v40, %v2713_v53  ;;  %v2633_v9 = vcombine.low %v1578_v28, %v1582_v24  ;;  %v2634_v26 = vcombine.low %v1586_v33, %v1590_v38 }
 0x22d   :  { %v2722_v49 = vrot.slane %v2714_v16, %v5935_v10  ;;  %v2635_v34 = vcombine.low %v1594_v13, %v1598_v52  ;;  %v1674_v48 = vrot.slane %v1400_v51, %v5909_v11  ;;  %v2636_v57 = vcombine.low %v1602_v46, %v1606_v12 }
 0x22e   :  { %4104 = vperm.xlu0 %4693, %v2583_v36   ;;  %v2729_v19 = vrot.slane %v2715_v23, %v5935_v10  ;;  %v2643_v21 = vrot.slane %v2633_v9, %v5935_v10  ;;  %v1678_v63 = vrot.slane %v1400_v51, %v5912_v61  ;;  %v2650_v29 = vrot.slane %v2634_v26, %v5935_v10  ;;  %v1397_v6 = vpop.xlane.xlu0 %1396 }
 0x22f   :  { %v2657_v43 = vrot.slane %v2635_v34, %v5935_v10  ;;  %v1682_v60 = vrot.slane %v1400_v51, %v5915_v59  ;;  %v1686_v31 = vrot.slane %v1400_v51, %v5918_v32  ;;  %v2632_v39 = vcombine.low %v2624_v25, %v2631_v45 }
 0x230   :  { %v2664_v30 = vrot.slane %v2636_v57, %v5935_v10  ;;  %v1690_v47 = vrot.slane %v1400_v51, %v5921_v8  ;;  %v1694_v2 = vrot.slane %v1400_v51, %v5924_v3  ;;  %v2665_v20 = vcombine.low %v2643_v21, %v2650_v29 }
 0x231   :  { %v1698_v44 = vrot.slane %v1400_v51, %v5928_v1  ;;  %v1702_v22 = vrot.slane %v1400_v51, %v5931_v7  ;;  %v2780_v0 = vcombine.low %v1674_v48, %v1678_v63  ;;  %v2730_v58 = vcombine.low %v2722_v49, %v2729_v19 }
 0x232   :  { %v2666_v41 = vcombine.low %v2657_v43, %v2664_v30  ;;  %v2781_v27 = vcombine.low %v1682_v60, %v1686_v31  ;;  %v2782_v54 = vcombine.low %v1690_v47, %v1694_v2  ;;  %v1642_v25 = vrot.slane %v1397_v6, %v5909_v11  ;;  %v1406_v15 = vpop.xlane.xlu1 %1405 }
 0x233   :  { %v2783_v62 = vcombine.low %v1698_v44, %v1702_v22  ;;  %v2790_v37 = vrot.slane %v2780_v0, %v5935_v10  ;;  %v1646_v45 = vrot.slane %v1397_v6, %v5912_v61  ;;  %v2673_v14 = vrot.slane %v2665_v20, %v5935_v10 }
 0x234   :  { %v2797_v56 = vrot.slane %v2781_v27, %v5935_v10  ;;  %v2804_v35 = vrot.slane %v2782_v54, %v5935_v10  ;;  %v1650_v42 = vrot.slane %v1397_v6, %v5915_v59  ;;  %v1654_v24 = vrot.slane %v1397_v6, %v5918_v32 }
 0x235   :  { %v2811_v28 = vrot.slane %v2783_v62, %v5935_v10  ;;  %v1658_v18 = vrot.slane %v1397_v6, %v5921_v8  ;;  %v1662_v50 = vrot.slane %v1397_v6, %v5924_v3  ;;  %v2680_v17 = vrot.slane %v2666_v41, %v5935_v10 }
 0x236   :  { %v2812_v40 = vcombine.low %v2790_v37, %v2797_v56  ;;  %v1666_v51 = vrot.slane %v1397_v6, %v5928_v1  ;;  %v1670_v5 = vrot.slane %v1397_v6, %v5931_v7  ;;  %v2731_v33 = vcombine.low %v1642_v25, %v1646_v45  ;;  %4107 = vperm.xlu1 %4692, %v2632_v39  }
 0x237   :  { %v2813_v53 = vcombine.low %v2804_v35, %v2811_v28  ;;  %v2732_v38 = vcombine.low %v1650_v42, %v1654_v24  ;;  %v2733_v16 = vcombine.low %v1658_v18, %v1662_v50  ;;  %v1738_v46 = vrot.slane %v1406_v15, %v5909_v11 }
 0x238   :  { %v2820_v13 = vrot.slane %v2812_v40, %v5935_v10  ;;  %v2734_v52 = vcombine.low %v1666_v51, %v1670_v5  ;;  %v1742_v36 = vrot.slane %v1406_v15, %v5912_v61  ;;  %v2741_v12 = vrot.slane %v2731_v33, %v5935_v10 }
 0x239   :  { %v2827_v23 = vrot.slane %v2813_v53, %v5935_v10  ;;  %v2748_v9 = vrot.slane %v2732_v38, %v5935_v10  ;;  %v2755_v49 = vrot.slane %v2733_v16, %v5935_v10  ;;  %v1746_v34 = vrot.slane %v1406_v15, %v5915_v59 }
 0x23a   :  { %v2762_v26 = vrot.slane %v2734_v52, %v5935_v10  ;;  %v1750_v48 = vrot.slane %v1406_v15, %v5918_v32  ;;  %v1754_v19 = vrot.slane %v1406_v15, %v5921_v8  ;;  %v2681_v57 = vcombine.low %v2673_v14, %v2680_v17  ;;  %4113 = vperm.xlu1 %4692, %v2730_v58   ;;  %v1403_v43 = vpop.xlane.xlu0 %1402 }
 0x23b   :  { %v2763_v21 = vcombine.low %v2741_v12, %v2748_v9  ;;  %v1758_v63 = vrot.slane %v1406_v15, %v5924_v3  ;;  %v1762_v29 = vrot.slane %v1406_v15, %v5928_v1  ;;  %v1766_v31 = vrot.slane %v1406_v15, %v5931_v7 }
 0x23c   :  { %v2764_v60 = vcombine.low %v2755_v49, %v2762_v26  ;;  %v2878_v6 = vcombine.low %v1738_v46, %v1742_v36  ;;  %v2879_v39 = vcombine.low %v1746_v34, %v1750_v48  ;;  %v2828_v30 = vcombine.low %v2820_v13, %v2827_v23 }
 0x23d   :  { %v2771_v47 = vrot.slane %v2763_v21, %v5935_v10  ;;  %v2880_v2 = vcombine.low %v1754_v19, %v1758_v63  ;;  %v1706_v20 = vrot.slane %v1403_v43, %v5909_v11  ;;  %v2881_v44 = vcombine.low %v1762_v29, %v1766_v31 }
 0x23e   :  { %v2888_v22 = vrot.slane %v2878_v6, %v5935_v10  ;;  %v2895_v0 = vrot.slane %v2879_v39, %v5935_v10  ;;  %v1710_v41 = vrot.slane %v1403_v43, %v5912_v61  ;;  %v2778_v58 = vrot.slane %v2764_v60, %v5935_v10  ;;  %v1412_v37 = vpop.xlane.xlu1 %1411  ;;  %4110 = vperm.xlu1 %4692, %v2681_v57  }
 0x23f   :  { %v2902_v27 = vrot.slane %v2880_v2, %v5935_v10  ;;  %v1714_v54 = vrot.slane %v1403_v43, %v5915_v59  ;;  %v1718_v62 = vrot.slane %v1403_v43, %v5918_v32  ;;  %v2909_v25 = vrot.slane %v2881_v44, %v5935_v10 }
 0x240   :  { %v2910_v45 = vcombine.low %v2888_v22, %v2895_v0  ;;  %v1722_v14 = vrot.slane %v1403_v43, %v5921_v8  ;;  %v1726_v56 = vrot.slane %v1403_v43, %v5924_v3  ;;  %v1802_v35 = vrot.slane %v1412_v37, %v5909_v11 }
 0x241   :  { %v1806_v42 = vrot.slane %v1412_v37, %v5912_v61  ;;  %v1810_v15 = vrot.slane %v1412_v37, %v5915_v59  ;;  %v1814_v28 = vrot.slane %v1412_v37, %v5918_v32  ;;  %v2911_v24 = vcombine.low %v2902_v27, %v2909_v25 }
 0x242   :  { %v2918_v18 = vrot.slane %v2910_v45, %v5935_v10  ;;  %v1818_v50 = vrot.slane %v1412_v37, %v5921_v8  ;;  %v1822_v17 = vrot.slane %v1412_v37, %v5924_v3  ;;  %v1826_v40 = vrot.slane %v1412_v37, %v5928_v1  ;;  %4119 = vperm.xlu1 %4692, %v2828_v30  }
 0x243   :  { %v1830_v51 = vrot.slane %v1412_v37, %v5931_v7  ;;  %v2976_v5 = vcombine.low %v1802_v35, %v1806_v42  ;;  %v2977_v53 = vcombine.low %v1810_v15, %v1814_v28  ;;  %v2925_v33 = vrot.slane %v2911_v24, %v5935_v10 }
 0x244   :  { %v2978_v38 = vcombine.low %v1818_v50, %v1822_v17  ;;  %v1730_v16 = vrot.slane %v1403_v43, %v5928_v1  ;;  %v1734_v13 = vrot.slane %v1403_v43, %v5931_v7  ;;  %v2829_v23 = vcombine.low %v1706_v20, %v1710_v41 }
 0x245   :  { %v2979_v52 = vcombine.low %v1826_v40, %v1830_v51  ;;  %v2986_v46 = vrot.slane %v2976_v5, %v5935_v10  ;;  %v2993_v36 = vrot.slane %v2977_v53, %v5935_v10  ;;  %v2779_v12 = vcombine.low %v2771_v47, %v2778_v58 }
 0x246   :  { %v3000_v9 = vrot.slane %v2978_v38, %v5935_v10  ;;  %v2830_v49 = vcombine.low %v1714_v54, %v1718_v62  ;;  %v2831_v26 = vcombine.low %v1722_v14, %v1726_v56  ;;  %v2832_v19 = vcombine.low %v1730_v16, %v1734_v13  ;;  %v1409_v21 = vpop.xlane.xlu0 %1408 }
 0x247   :  { %v3007_v34 = vrot.slane %v2979_v52, %v5935_v10  ;;  %v3008_v48 = vcombine.low %v2986_v46, %v2993_v36  ;;  %v2839_v57 = vrot.slane %v2829_v23, %v5935_v10  ;;  %4116 = vperm.xlu1 %4692, %v2779_v12   ;;  %v2926_v63 = vcombine.low %v2918_v18, %v2925_v33 }
 0x248   :  { %v2846_v29 = vrot.slane %v2830_v49, %v5935_v10  ;;  %v2853_v43 = vrot.slane %v2831_v26, %v5935_v10  ;;  %v2860_v6 = vrot.slane %v2832_v19, %v5935_v10  ;;  %v1770_v39 = vrot.slane %v1409_v21, %v5909_v11 }
 0x249   :  { %v3009_v60 = vcombine.low %v3000_v9, %v3007_v34  ;;  %v3016_v31 = vrot.slane %v3008_v48, %v5935_v10  ;;  %v1774_v47 = vrot.slane %v1409_v21, %v5912_v61  ;;  %v1778_v2 = vrot.slane %v1409_v21, %v5915_v59 }
 0x24a   :  { %v2861_v30 = vcombine.low %v2839_v57, %v2846_v29  ;;  %v1782_v20 = vrot.slane %v1409_v21, %v5918_v32  ;;  %v2862_v22 = vcombine.low %v2853_v43, %v2860_v6  ;;  %v1786_v0 = vrot.slane %v1409_v21, %v5921_v8  ;;  %v1418_v58 = vpop.xlane.xlu1 %1417 }
 0x24b   :  { %v3023_v44 = vrot.slane %v3009_v60, %v5935_v10  ;;  %v1790_v41 = vrot.slane %v1409_v21, %v5924_v3  ;;  %4125 = vperm.xlu1 %4692, %v2926_v63   ;;  %v1794_v54 = vrot.slane %v1409_v21, %v5928_v1  ;;  %v1798_v62 = vrot.slane %v1409_v21, %v5931_v7 }
 0x24c   :  { %v2869_v27 = vrot.slane %v2861_v30, %v5935_v10  ;;  %v2927_v37 = vcombine.low %v1770_v39, %v1774_v47  ;;  %v2876_v45 = vrot.slane %v2862_v22, %v5935_v10  ;;  %v2928_v14 = vcombine.low %v1778_v2, %v1782_v20 }
 0x24d   :  { %v3024_v25 = vcombine.low %v3016_v31, %v3023_v44  ;;  %v2929_v56 = vcombine.low %v1786_v0, %v1790_v41  ;;  %v2930_v35 = vcombine.low %v1794_v54, %v1798_v62  ;;  %v1866_v15 = vrot.slane %v1418_v58, %v5909_v11 }
 0x24e   :  { %v2937_v42 = vrot.slane %v2927_v37, %v5935_v10  ;;  %v1870_v28 = vrot.slane %v1418_v58, %v5912_v61  ;;  %v2877_v24 = vcombine.low %v2869_v27, %v2876_v45  ;;  %v2944_v18 = vrot.slane %v2928_v14, %v5935_v10 }
 0x24f   :  { %4131 = vperm.xlu0 %4693, %v3024_v25   ;;  %v2951_v50 = vrot.slane %v2929_v56, %v5935_v10  ;;  %v1874_v17 = vrot.slane %v1418_v58, %v5915_v59  ;;  %v2958_v40 = vrot.slane %v2930_v35, %v5935_v10  ;;  %v1878_v51 = vrot.slane %v1418_v58, %v5918_v32 }
 0x250   :  { %v1882_v5 = vrot.slane %v1418_v58, %v5921_v8  ;;  %v1886_v53 = vrot.slane %v1418_v58, %v5924_v3  ;;  %4122 = vperm.xlu1 %4692, %v2877_v24   ;;  %v2959_v33 = vcombine.low %v2937_v42, %v2944_v18  ;;  %v1890_v38 = vrot.slane %v1418_v58, %v5928_v1 }
 0x251   :  { %v1894_v16 = vrot.slane %v1418_v58, %v5931_v7  ;;  %v3074_v13 = vcombine.low %v1866_v15, %v1870_v28  ;;  %v2960_v52 = vcombine.low %v2951_v50, %v2958_v40  ;;  %v3075_v46 = vcombine.low %v1874_v17, %v1878_v51 }
 0x252   :  { %v3076_v36 = vcombine.low %v1882_v5, %v1886_v53  ;;  %v2967_v23 = vrot.slane %v2959_v33, %v5935_v10  ;;  %v1415_v49 = vpop.xlane.xlu0 %1414 }
 0x253   :  { %v3077_v12 = vcombine.low %v1890_v38, %v1894_v16  ;;  %v3084_v9 = vrot.slane %v3074_v13, %v5935_v10  ;;  %v2974_v26 = vrot.slane %v2960_v52, %v5935_v10  ;;  %v3091_v34 = vrot.slane %v3075_v46, %v5935_v10 }
 0x254   :  { %v3098_v48 = vrot.slane %v3076_v36, %v5935_v10  ;;  %v1834_v57 = vrot.slane %v1415_v49, %v5909_v11  ;;  %v1838_v21 = vrot.slane %v1415_v49, %v5912_v61  ;;  %v1842_v63 = vrot.slane %v1415_v49, %v5915_v59 }
 0x255   :  { %v3105_v19 = vrot.slane %v3077_v12, %v5935_v10  ;;  %v2975_v29 = vcombine.low %v2967_v23, %v2974_v26  ;;  %v3106_v43 = vcombine.low %v3084_v9, %v3091_v34  ;;  %v1846_v60 = vrot.slane %v1415_v49, %v5918_v32 }
 0x256   :  { %v1850_v31 = vrot.slane %v1415_v49, %v5921_v8  ;;  %v1854_v39 = vrot.slane %v1415_v49, %v5924_v3  ;;  %v1858_v30 = vrot.slane %v1415_v49, %v5928_v1  ;;  %v1862_v47 = vrot.slane %v1415_v49, %v5931_v7  ;;  %v1424_v2 = vpop.xlane.xlu1 %1423 }
 0x257   :  { %v3107_v6 = vcombine.low %v3098_v48, %v3105_v19  ;;  %4128 = vperm.xlu1 %4692, %v2975_v29   ;;  %v3114_v20 = vrot.slane %v3106_v43, %v5935_v10  ;;  %v3025_v44 = vcombine.low %v1834_v57, %v1838_v21  ;;  %v3026_v22 = vcombine.low %v1842_v63, %v1846_v60 }
 0x258   :  { %v3027_v41 = vcombine.low %v1850_v31, %v1854_v39  ;;  %v3028_v58 = vcombine.low %v1858_v30, %v1862_v47  ;;  %v1930_v27 = vrot.slane %v1424_v2, %v5909_v11  ;;  %v1934_v37 = vrot.slane %v1424_v2, %v5912_v61 }
 0x259   :  { %v3121_v0 = vrot.slane %v3107_v6, %v5935_v10  ;;  %v3035_v54 = vrot.slane %v3025_v44, %v5935_v10  ;;  %v3042_v62 = vrot.slane %v3026_v22, %v5935_v10  ;;  %v1938_v25 = vrot.slane %v1424_v2, %v5915_v59 }
 0x25a   :  { %v3049_v14 = vrot.slane %v3027_v41, %v5935_v10  ;;  %v3056_v56 = vrot.slane %v3028_v58, %v5935_v10  ;;  %v1942_v35 = vrot.slane %v1424_v2, %v5918_v32  ;;  %v1946_v15 = vrot.slane %v1424_v2, %v5921_v8 }
 0x25b   :  { %v3122_v45 = vcombine.low %v3114_v20, %v3121_v0  ;;  %v3057_v42 = vcombine.low %v3035_v54, %v3042_v62  ;;  %v1950_v28 = vrot.slane %v1424_v2, %v5924_v3  ;;  %v1954_v24 = vrot.slane %v1424_v2, %v5928_v1 }
 0x25c   :  { %v3058_v18 = vcombine.low %v3049_v14, %v3056_v56  ;;  %v1958_v50 = vrot.slane %v1424_v2, %v5931_v7  ;;  %v3172_v17 = vcombine.low %v1930_v27, %v1934_v37  ;;  %v3173_v40 = vcombine.low %v1938_v25, %v1942_v35 }
 0x25d   :  { %4137 = vperm.xlu1 %4692, %v3122_v45   ;;  %v3065_v51 = vrot.slane %v3057_v42, %v5935_v10  ;;  %v3174_v5 = vcombine.low %v1946_v15, %v1950_v28 }
 0x25e   :  { %v3072_v53 = vrot.slane %v3058_v18, %v5935_v10  ;;  %v3175_v33 = vcombine.low %v1954_v24, %v1958_v50  ;;  %v3182_v38 = vrot.slane %v3172_v17, %v5935_v10  ;;  %v3189_v16 = vrot.slane %v3173_v40, %v5935_v10  ;;  %v1421_v13 = vpop.xlane.xlu0 %1420 }
 0x25f   :  { %v3196_v52 = vrot.slane %v3174_v5, %v5935_v10  ;;  %v1898_v12 = vrot.slane %v1421_v13, %v5909_v11  ;;  %v1902_v9 = vrot.slane %v1421_v13, %v5912_v61  ;;  %v1906_v49 = vrot.slane %v1421_v13, %v5915_v59 }
 0x260   :  { %v3073_v46 = vcombine.low %v3065_v51, %v3072_v53  ;;  %v3203_v36 = vrot.slane %v3175_v33, %v5935_v10  ;;  %v3204_v23 = vcombine.low %v3182_v38, %v3189_v16  ;;  %v1910_v26 = vrot.slane %v1421_v13, %v5918_v32 }
 0x261   :  { %v1914_v34 = vrot.slane %v1421_v13, %v5921_v8  ;;  %v1918_v57 = vrot.slane %v1421_v13, %v5924_v3  ;;  %v1922_v21 = vrot.slane %v1421_v13, %v5928_v1  ;;  %v1926_v63 = vrot.slane %v1421_v13, %v5931_v7 }
 0x262   :  { %4134 = vperm.xlu1 %4692, %v3073_v46   ;;  %v3205_v48 = vcombine.low %v3196_v52, %v3203_v36  ;;  %v3212_v19 = vrot.slane %v3204_v23, %v5935_v10  ;;  %v3123_v29 = vcombine.low %v1898_v12, %v1902_v9  ;;  %v3124_v43 = vcombine.low %v1906_v49, %v1910_v26 }
 0x263   :  { %v3125_v31 = vcombine.low %v1914_v34, %v1918_v57  ;;  %v3126_v6 = vcombine.low %v1922_v21, %v1926_v63 }
 0x264   :  { %v3219_v60 = vrot.slane %v3205_v48, %v5935_v10  ;;  %v3133_v39 = vrot.slane %v3123_v29, %v5935_v10  ;;  %v3140_v30 = vrot.slane %v3124_v43, %v5935_v10 }
 0x265   :  { %v3147_v2 = vrot.slane %v3125_v31, %v5935_v10  ;;  %v3154_v44 = vrot.slane %v3126_v6, %v5935_v10 }
 0x266   :  { %v3220_v47 = vcombine.low %v3212_v19, %v3219_v60  ;;  %v1427_v20 = vpop.xlane.xlu0 %1426  ;;  %v3155_v22 = vcombine.low %v3133_v39, %v3140_v30 }
 0x267   :  { %v3156_v0 = vcombine.low %v3147_v2, %v3154_v44  ;;  %v1962_v58 = vrot.slane %v1427_v20, %v5909_v11  ;;  %v1966_v27 = vrot.slane %v1427_v20, %v5912_v61  ;;  %v1970_v54 = vrot.slane %v1427_v20, %v5915_v59 }
 0x268   :  { %4143 = vperm.xlu1 %4692, %v3220_v47   ;;  %v3163_v41 = vrot.slane %v3155_v22, %v5935_v10  ;;  %v1974_v62 = vrot.slane %v1427_v20, %v5918_v32  ;;  %v1978_v37 = vrot.slane %v1427_v20, %v5921_v8  ;;  %v1982_v45 = vrot.slane %v1427_v20, %v5924_v3 }
 0x269   :  { %v3170_v25 = vrot.slane %v3156_v0, %v5935_v10  ;;  %v1986_v14 = vrot.slane %v1427_v20, %v5928_v1  ;;  %v1990_v56 = vrot.slane %v1427_v20, %v5931_v7  ;;  %v3221_v42 = vcombine.low %v1962_v58, %v1966_v27 }
 0x26a   :  { %v3222_v15 = vcombine.low %v1970_v54, %v1974_v62  ;;  %v3223_v24 = vcombine.low %v1978_v37, %v1982_v45 }
 0x26b   :  { %v3171_v35 = vcombine.low %v3163_v41, %v3170_v25  ;;  %v3224_v18 = vcombine.low %v1986_v14, %v1990_v56  ;;  %v3231_v52 = vrot.slane %v3221_v42, %v5935_v10 }
 0x26c   :  { %v3238_v46 = vrot.slane %v3222_v15, %v5935_v10  ;;  %v3245_v12 = vrot.slane %v3223_v24, %v5935_v10 }
 0x26d   :  { %4140 = vperm.xlu1 %4692, %v3171_v35   ;;  %v3252_v9 = vrot.slane %v3224_v18, %v5935_v10 }
 0x26e   :  { %v1433_v28 = vpop.xlane.xlu0 %1432  ;;  %v6166_v57 = vcombine.low %v3231_v52, %v3238_v46 }
 0x26f   :  { %v2026_v50 = vrot.slane %v1433_v28, %v5909_v11  ;;  %v2030_v17 = vrot.slane %v1433_v28, %v5912_v61  ;;  %v2034_v40 = vrot.slane %v1433_v28, %v5915_v59  ;;  %v2038_v51 = vrot.slane %v1433_v28, %v5918_v32 }
 0x270   :  { %v2042_v5 = vrot.slane %v1433_v28, %v5921_v8  ;;  %v2046_v53 = vrot.slane %v1433_v28, %v5924_v3  ;;  %v2050_v33 = vrot.slane %v1433_v28, %v5928_v1  ;;  %v2054_v38 = vrot.slane %v1433_v28, %v5931_v7 }
 0x271   :  { %v3319_v16 = vcombine.low %v2026_v50, %v2030_v17  ;;  %v3320_v13 = vcombine.low %v2034_v40, %v2038_v51  ;;  %v6168_v29 = vcombine.low %v3245_v12, %v3252_v9  ;;  %v3261_v0 = vrot.slane %v6166_v57, %v5935_v10 }
 0x272   :  { %v3321_v36 = vcombine.low %v2042_v5, %v2046_v53  ;;  %v3322_v23 = vcombine.low %v2050_v33, %v2054_v38 }
 0x273   :  { %v3329_v49 = vrot.slane %v3319_v16, %v5935_v10  ;;  %v3336_v26 = vrot.slane %v3320_v13, %v5935_v10  ;;  %v3268_v62 = vrot.slane %v6168_v29, %v5935_v10 }
 0x274   :  { %v3343_v34 = vrot.slane %v3321_v36, %v5935_v10  ;;  %v3350_v48 = vrot.slane %v3322_v23, %v5935_v10 }
 0x275   :  { %v3351_v19 = vcombine.low %v3329_v49, %v3336_v26 }
 0x276   :  { %v1439_v21 = vpop.xlane.xlu0 %1438  ;;  %v3352_v63 = vcombine.low %v3343_v34, %v3350_v48 }
 0x277   :  { %v3359_v43 = vrot.slane %v3351_v19, %v5935_v10  ;;  %v2090_v60 = vrot.slane %v1439_v21, %v5909_v11  ;;  %v2094_v31 = vrot.slane %v1439_v21, %v5912_v61  ;;  %v2098_v6 = vrot.slane %v1439_v21, %v5915_v59 }
 0x278   :  { %v3366_v39 = vrot.slane %v3352_v63, %v5935_v10  ;;  %v2102_v30 = vrot.slane %v1439_v21, %v5918_v32  ;;  %v2106_v47 = vrot.slane %v1439_v21, %v5921_v8  ;;  %v2110_v2 = vrot.slane %v1439_v21, %v5924_v3 }
 0x279   :  { %v2114_v20 = vrot.slane %v1439_v21, %v5928_v1  ;;  %v2118_v44 = vrot.slane %v1439_v21, %v5931_v7  ;;  %v3417_v22 = vcombine.low %v2090_v60, %v2094_v31 }
 0x27a   :  { %v1445_v41 = vpop.xlane.xlu0 %1444  ;;  %v3367_v58 = vcombine.low %v3359_v43, %v3366_v39  ;;  %v3418_v27 = vcombine.low %v2098_v6, %v2102_v30  ;;  %v3419_v54 = vcombine.low %v2106_v47, %v2110_v2 }
 0x27b   :  { %v3420_v37 = vcombine.low %v2114_v20, %v2118_v44  ;;  %v3427_v25 = vrot.slane %v3417_v22, %v5935_v10  ;;  %v2154_v45 = vrot.slane %v1445_v41, %v5909_v11  ;;  %v2158_v14 = vrot.slane %v1445_v41, %v5912_v61 }
 0x27c   :  { %4152 = vperm.xlu1 %4692, %v3367_v58   ;;  %v3434_v56 = vrot.slane %v3418_v27, %v5935_v10  ;;  %v3441_v35 = vrot.slane %v3419_v54, %v5935_v10  ;;  %v2162_v42 = vrot.slane %v1445_v41, %v5915_v59  ;;  %v2166_v15 = vrot.slane %v1445_v41, %v5918_v32 }
 0x27d   :  { %v3448_v28 = vrot.slane %v3420_v37, %v5935_v10  ;;  %v2170_v24 = vrot.slane %v1445_v41, %v5921_v8  ;;  %v2174_v18 = vrot.slane %v1445_v41, %v5924_v3  ;;  %v2178_v50 = vrot.slane %v1445_v41, %v5928_v1 }
 0x27e   :  { %v1451_v17 = vpop.xlane.xlu0 %1450  ;;  %v3449_v40 = vcombine.low %v3427_v25, %v3434_v56  ;;  %v2182_v51 = vrot.slane %v1445_v41, %v5931_v7  ;;  %v3515_v5 = vcombine.low %v2154_v45, %v2158_v14  ;;  %v3516_v53 = vcombine.low %v2162_v42, %v2166_v15 }
 0x27f   :  { %v3450_v33 = vcombine.low %v3441_v35, %v3448_v28  ;;  %v3517_v38 = vcombine.low %v2170_v24, %v2174_v18  ;;  %v2218_v16 = vrot.slane %v1451_v17, %v5909_v11  ;;  %v2222_v13 = vrot.slane %v1451_v17, %v5912_v61 }
 0x280   :  { %v3457_v52 = vrot.slane %v3449_v40, %v5935_v10  ;;  %v3518_v46 = vcombine.low %v2178_v50, %v2182_v51  ;;  %v3525_v36 = vrot.slane %v3515_v5, %v5935_v10  ;;  %v3532_v23 = vrot.slane %v3516_v53, %v5935_v10 }
 0x281   :  { %v3464_v12 = vrot.slane %v3450_v33, %v5935_v10  ;;  %v3539_v9 = vrot.slane %v3517_v38, %v5935_v10  ;;  %v2226_v49 = vrot.slane %v1451_v17, %v5915_v59  ;;  %v2230_v26 = vrot.slane %v1451_v17, %v5918_v32 }
 0x282   :  { %v1457_v34 = vpop.xlane.xlu0 %1456  ;;  %v3546_v48 = vrot.slane %v3518_v46, %v5935_v10  ;;  %v3547_v19 = vcombine.low %v3525_v36, %v3532_v23  ;;  %v2234_v21 = vrot.slane %v1451_v17, %v5921_v8  ;;  %v2238_v63 = vrot.slane %v1451_v17, %v5924_v3 }
 0x283   :  { %v3465_v43 = vcombine.low %v3457_v52, %v3464_v12  ;;  %v2242_v60 = vrot.slane %v1451_v17, %v5928_v1  ;;  %v2246_v31 = vrot.slane %v1451_v17, %v5931_v7  ;;  %v3613_v6 = vcombine.low %v2218_v16, %v2222_v13 }
 0x284   :  { %v3548_v39 = vcombine.low %v3539_v9, %v3546_v48  ;;  %v3555_v30 = vrot.slane %v3547_v19, %v5935_v10  ;;  %v3614_v47 = vcombine.low %v2226_v49, %v2230_v26  ;;  %v3615_v2 = vcombine.low %v2234_v21, %v2238_v63 }
 0x285   :  { %4158 = vperm.xlu1 %4692, %v3465_v43   ;;  %v3616_v20 = vcombine.low %v2242_v60, %v2246_v31  ;;  %v3623_v44 = vrot.slane %v3613_v6, %v5935_v10  ;;  %v2282_v22 = vrot.slane %v1457_v34, %v5909_v11  ;;  %v2286_v41 = vrot.slane %v1457_v34, %v5912_v61 }
 0x286   :  { %v3562_v58 = vrot.slane %v3548_v39, %v5935_v10  ;;  %v3630_v27 = vrot.slane %v3614_v47, %v5935_v10  ;;  %v3637_v54 = vrot.slane %v3615_v2, %v5935_v10  ;;  %v2290_v37 = vrot.slane %v1457_v34, %v5915_v59 }
 0x287   :  { %v3644_v45 = vrot.slane %v3616_v20, %v5935_v10  ;;  %v2294_v14 = vrot.slane %v1457_v34, %v5918_v32  ;;  %v2298_v56 = vrot.slane %v1457_v34, %v5921_v8  ;;  %v2302_v35 = vrot.slane %v1457_v34, %v5924_v3 }
 0x288   :  { %v1463_v25 = vpop.xlane.xlu0 %1462  ;;  %v3563_v42 = vcombine.low %v3555_v30, %v3562_v58  ;;  %v3645_v15 = vcombine.low %v3623_v44, %v3630_v27  ;;  %v2306_v28 = vrot.slane %v1457_v34, %v5928_v1  ;;  %v2310_v24 = vrot.slane %v1457_v34, %v5931_v7 }
 0x289   :  { %v3646_v18 = vcombine.low %v3637_v54, %v3644_v45  ;;  %v3711_v50 = vcombine.low %v2282_v22, %v2286_v41  ;;  %v3712_v17 = vcombine.low %v2290_v37, %v2294_v14  ;;  %v3713_v40 = vcombine.low %v2298_v56, %v2302_v35 }
 0x28a   :  { %4164 = vperm.xlu1 %4692, %v3563_v42   ;;  %v3653_v51 = vrot.slane %v3645_v15, %v5935_v10  ;;  %v3714_v5 = vcombine.low %v2306_v28, %v2310_v24  ;;  %v2346_v53 = vrot.slane %v1463_v25, %v5909_v11  ;;  %v2350_v33 = vrot.slane %v1463_v25, %v5912_v61 }
 0x28b   :  { %v3660_v38 = vrot.slane %v3646_v18, %v5935_v10  ;;  %v3721_v16 = vrot.slane %v3711_v50, %v5935_v10  ;;  %v3728_v13 = vrot.slane %v3712_v17, %v5935_v10  ;;  %v3735_v52 = vrot.slane %v3713_v40, %v5935_v10 }
 0x28c   :  { %v3742_v46 = vrot.slane %v3714_v5, %v5935_v10  ;;  %v2354_v36 = vrot.slane %v1463_v25, %v5915_v59  ;;  %v2358_v23 = vrot.slane %v1463_v25, %v5918_v32  ;;  %v2362_v12 = vrot.slane %v1463_v25, %v5921_v8  ;;  %v6237_v48 = vpop.xlane.xlu0 %1468 }
 0x28d   :  { %v3661_v9 = vcombine.low %v3653_v51, %v3660_v38  ;;  %v3743_v49 = vcombine.low %v3721_v16, %v3728_v13  ;;  %v2366_v26 = vrot.slane %v1463_v25, %v5924_v3  ;;  %v2370_v34 = vrot.slane %v1463_v25, %v5928_v1 }
 0x28e   :  { %v3744_v19 = vcombine.low %v3735_v52, %v3742_v46  ;;  %v2374_v21 = vrot.slane %v1463_v25, %v5931_v7  ;;  %v3809_v63 = vcombine.low %v2346_v53, %v2350_v33  ;;  %v3810_v43 = vcombine.low %v2354_v36, %v2358_v23 }
 0x28f   :  { %4170 = vperm.xlu1 %4692, %v3661_v9   ;;  %v3751_v60 = vrot.slane %v3743_v49, %v5935_v10  ;;  %v6241_v31 = vcombine.low %v2362_v12, %v2366_v26  ;;  %v3269_v39 = vcombine.low %v3261_v0, %v3268_v62  ;;  %v2410_v2 = vrot.slane %v6237_v48, %v5909_v11 }
 0x290   :  { %v3758_v6 = vrot.slane %v3744_v19, %v5935_v10  ;;  %v6250_v30 = vcombine.low %v2370_v34, %v2374_v21  ;;  %v3819_v47 = vrot.slane %v3809_v63, %v5935_v10  ;;  %v2414_v20 = vrot.slane %v6237_v48, %v5912_v61 }
 0x291   :  { %v3826_v41 = vrot.slane %v3810_v43, %v5935_v10  ;;  %v3833_v29 = vrot.slane %v6241_v31, %v5935_v10  ;;  %v2418_v57 = vrot.slane %v6237_v48, %v5915_v59  ;;  %v2422_v35 = vrot.slane %v6237_v48, %v5918_v32 }
 0x292   :  { %v3759_v44 = vcombine.low %v3751_v60, %v3758_v6  ;;  %v1430_v22 = vpop.xlane.xlu1 %1429  ;;  %v2426_v42 = vrot.slane %v6237_v48, %v5921_v8  ;;  %v3840_v18 = vrot.slane %v6250_v30, %v5935_v10 }
 0x293   :  { %v1994_v0 = vrot.slane %v1430_v22, %v5909_v11  ;;  %v1998_v62 = vrot.slane %v1430_v22, %v5912_v61  ;;  %v2002_v58 = vrot.slane %v1430_v22, %v5915_v59  ;;  %v2006_v27 = vrot.slane %v1430_v22, %v5918_v32 }
 0x294   :  { %4176 = vperm.xlu1 %4692, %v3759_v44   ;;  %v2010_v54 = vrot.slane %v1430_v22, %v5921_v8  ;;  %v2014_v37 = vrot.slane %v1430_v22, %v5924_v3  ;;  %v2018_v25 = vrot.slane %v1430_v22, %v5928_v1  ;;  %v2022_v45 = vrot.slane %v1430_v22, %v5931_v7 }
 0x295   :  { %v3270_v14 = vcombine.low %v1994_v0, %v1998_v62  ;;  %v3271_v56 = vcombine.low %v2002_v58, %v2006_v27  ;;  %v6276_v50 = vcombine.low %v3819_v47, %v3826_v41 }
 0x296   :  { %v1436_v15 = vpop.xlane.xlu1 %1435  ;;  %v3272_v28 = vcombine.low %v2010_v54, %v2014_v37  ;;  %v3273_v24 = vcombine.low %v2018_v25, %v2022_v45 }
 0x297   :  { %v3280_v17 = vrot.slane %v3270_v14, %v5935_v10  ;;  %v3287_v40 = vrot.slane %v3271_v56, %v5935_v10  ;;  %v2058_v51 = vrot.slane %v1436_v15, %v5909_v11  ;;  %v2062_v5 = vrot.slane %v1436_v15, %v5912_v61 }
 0x298   :  { %4146 = vperm.xlu1 %4692, %v3269_v39   ;;  %v3294_v53 = vrot.slane %v3272_v28, %v5935_v10  ;;  %v3301_v33 = vrot.slane %v3273_v24, %v5935_v10  ;;  %v2066_v38 = vrot.slane %v1436_v15, %v5915_v59  ;;  %v2070_v16 = vrot.slane %v1436_v15, %v5918_v32 }
 0x299   :  { %v3302_v13 = vcombine.low %v3280_v17, %v3287_v40  ;;  %v2074_v52 = vrot.slane %v1436_v15, %v5921_v8  ;;  %v2078_v46 = vrot.slane %v1436_v15, %v5924_v3  ;;  %v2082_v36 = vrot.slane %v1436_v15, %v5928_v1 }
 0x29a   :  { %v1442_v23 = vpop.xlane.xlu1 %1441  ;;  %v3303_v12 = vcombine.low %v3294_v53, %v3301_v33  ;;  %v2086_v9 = vrot.slane %v1436_v15, %v5931_v7  ;;  %v3368_v49 = vcombine.low %v2058_v51, %v2062_v5  ;;  %v3369_v26 = vcombine.low %v2066_v38, %v2070_v16 }
 0x29b   :  { %v3310_v34 = vrot.slane %v3302_v13, %v5935_v10  ;;  %v3370_v19 = vcombine.low %v2074_v52, %v2078_v46  ;;  %v2122_v21 = vrot.slane %v1442_v23, %v5909_v11  ;;  %v2126_v63 = vrot.slane %v1442_v23, %v5912_v61 }
 0x29c   :  { %v3317_v43 = vrot.slane %v3303_v12, %v5935_v10  ;;  %v3371_v60 = vcombine.low %v2082_v36, %v2086_v9  ;;  %v3378_v6 = vrot.slane %v3368_v49, %v5935_v10  ;;  %v3385_v39 = vrot.slane %v3369_v26, %v5935_v10 }
 0x29d   :  { %v3392_v47 = vrot.slane %v3370_v19, %v5935_v10  ;;  %v2130_v44 = vrot.slane %v1442_v23, %v5915_v59  ;;  %v2134_v22 = vrot.slane %v1442_v23, %v5918_v32  ;;  %v2138_v41 = vrot.slane %v1442_v23, %v5921_v8 }
 0x29e   :  { %v1448_v0 = vpop.xlane.xlu1 %1447  ;;  %v3318_v62 = vcombine.low %v3310_v34, %v3317_v43  ;;  %v3399_v58 = vrot.slane %v3371_v60, %v5935_v10  ;;  %v3400_v27 = vcombine.low %v3378_v6, %v3385_v39  ;;  %v2142_v54 = vrot.slane %v1442_v23, %v5924_v3 }
 0x29f   :  { %v2146_v37 = vrot.slane %v1442_v23, %v5928_v1  ;;  %v2150_v25 = vrot.slane %v1442_v23, %v5931_v7  ;;  %v3466_v45 = vcombine.low %v2122_v21, %v2126_v63  ;;  %v3467_v14 = vcombine.low %v2130_v44, %v2134_v22 }
 0x2a0   :  { %4149 = vperm.xlu1 %4692, %v3318_v62   ;;  %v3401_v56 = vcombine.low %v3392_v47, %v3399_v58  ;;  %v3408_v15 = vrot.slane %v3400_v27, %v5935_v10  ;;  %v3468_v28 = vcombine.low %v2138_v41, %v2142_v54  ;;  %v2186_v24 = vrot.slane %v1448_v0, %v5909_v11 }
 0x2a1   :  { %v3469_v17 = vcombine.low %v2146_v37, %v2150_v25  ;;  %v3476_v40 = vrot.slane %v3466_v45, %v5935_v10  ;;  %v3483_v51 = vrot.slane %v3467_v14, %v5935_v10  ;;  %v2190_v5 = vrot.slane %v1448_v0, %v5912_v61 }
 0x2a2   :  { %v1454_v53 = vpop.xlane.xlu1 %1453  ;;  %v3415_v33 = vrot.slane %v3401_v56, %v5935_v10  ;;  %v3490_v38 = vrot.slane %v3468_v28, %v5935_v10  ;;  %v2194_v16 = vrot.slane %v1448_v0, %v5915_v59  ;;  %v2198_v13 = vrot.slane %v1448_v0, %v5918_v32 }
 0x2a3   :  { %v3497_v52 = vrot.slane %v3469_v17, %v5935_v10  ;;  %v3498_v46 = vcombine.low %v3476_v40, %v3483_v51  ;;  %v2202_v36 = vrot.slane %v1448_v0, %v5921_v8  ;;  %v2206_v23 = vrot.slane %v1448_v0, %v5924_v3 }
 0x2a4   :  { %v3416_v12 = vcombine.low %v3408_v15, %v3415_v33  ;;  %v2210_v9 = vrot.slane %v1448_v0, %v5928_v1  ;;  %v2214_v49 = vrot.slane %v1448_v0, %v5931_v7  ;;  %v3564_v26 = vcombine.low %v2186_v24, %v2190_v5 }
 0x2a5   :  { %v3499_v34 = vcombine.low %v3490_v38, %v3497_v52  ;;  %v3506_v19 = vrot.slane %v3498_v46, %v5935_v10  ;;  %v3565_v21 = vcombine.low %v2194_v16, %v2198_v13  ;;  %v3566_v63 = vcombine.low %v2202_v36, %v2206_v23 }
 0x2a6   :  { %4155 = vperm.xlu0 %4693, %v3416_v12   ;;  %v3567_v43 = vcombine.low %v2210_v9, %v2214_v49  ;;  %v3574_v60 = vrot.slane %v3564_v26, %v5935_v10  ;;  %v2250_v6 = vrot.slane %v1454_v53, %v5909_v11  ;;  %v2254_v39 = vrot.slane %v1454_v53, %v5912_v61  ;;  %v1460_v47 = vpop.xlane.xlu1 %1459 }
 0x2a7   :  { %v3513_v44 = vrot.slane %v3499_v34, %v5935_v10  ;;  %v3581_v22 = vrot.slane %v3565_v21, %v5935_v10  ;;  %v3588_v41 = vrot.slane %v3566_v63, %v5935_v10  ;;  %v2258_v0 = vrot.slane %v1454_v53, %v5915_v59 }
 0x2a8   :  { %v3595_v62 = vrot.slane %v3567_v43, %v5935_v10  ;;  %v2262_v58 = vrot.slane %v1454_v53, %v5918_v32  ;;  %v2266_v27 = vrot.slane %v1454_v53, %v5921_v8  ;;  %v2270_v54 = vrot.slane %v1454_v53, %v5924_v3 }
 0x2a9   :  { %v3514_v37 = vcombine.low %v3506_v19, %v3513_v44  ;;  %v3596_v25 = vcombine.low %v3574_v60, %v3581_v22  ;;  %v2274_v45 = vrot.slane %v1454_v53, %v5928_v1  ;;  %v2278_v14 = vrot.slane %v1454_v53, %v5931_v7 }
 0x2aa   :  { %v3597_v56 = vcombine.low %v3588_v41, %v3595_v62  ;;  %v3662_v15 = vcombine.low %v2250_v6, %v2254_v39  ;;  %v3663_v28 = vcombine.low %v2258_v0, %v2262_v58  ;;  %v3664_v24 = vcombine.low %v2266_v27, %v2270_v54  ;;  %v1466_v13 = vpop.xlane.xlu1 %1465 }
 0x2ab   :  { %4161 = vperm.xlu0 %4693, %v3514_v37   ;;  %v3604_v17 = vrot.slane %v3596_v25, %v5935_v10  ;;  %v3665_v40 = vcombine.low %v2274_v45, %v2278_v14  ;;  %v2314_v51 = vrot.slane %v1460_v47, %v5909_v11  ;;  %v2318_v5 = vrot.slane %v1460_v47, %v5912_v61 }
 0x2ac   :  { %v3611_v33 = vrot.slane %v3597_v56, %v5935_v10  ;;  %v3672_v38 = vrot.slane %v3662_v15, %v5935_v10  ;;  %v3679_v16 = vrot.slane %v3663_v28, %v5935_v10  ;;  %v2430_v53 = vrot.slane %v6237_v48, %v5924_v3 }
 0x2ad   :  { %v3686_v52 = vrot.slane %v3664_v24, %v5935_v10  ;;  %v3693_v46 = vrot.slane %v3665_v40, %v5935_v10  ;;  %v2322_v36 = vrot.slane %v1460_v47, %v5915_v59  ;;  %v2326_v23 = vrot.slane %v1460_v47, %v5918_v32 }
 0x2ae   :  { %v3612_v12 = vcombine.low %v3604_v17, %v3611_v33  ;;  %v3694_v9 = vcombine.low %v3672_v38, %v3679_v16  ;;  %v2330_v49 = vrot.slane %v1460_v47, %v5921_v8  ;;  %v2334_v26 = vrot.slane %v1460_v47, %v5924_v3  ;;  %v1472_v14 = vpop.xlane.xlu1 %1471 }
 0x2af   :  { %v3695_v34 = vcombine.low %v3686_v52, %v3693_v46  ;;  %v2338_v19 = vrot.slane %v1460_v47, %v5928_v1  ;;  %v2342_v21 = vrot.slane %v1460_v47, %v5931_v7  ;;  %v3760_v63 = vcombine.low %v2314_v51, %v2318_v5 }
 0x2b0   :  { %4167 = vperm.xlu0 %4693, %v3612_v12   ;;  %v3702_v43 = vrot.slane %v3694_v9, %v5935_v10  ;;  %v3761_v60 = vcombine.low %v2322_v36, %v2326_v23  ;;  %v3762_v6 = vcombine.low %v2330_v49, %v2334_v26  ;;  %v2378_v39 = vrot.slane %v1466_v13, %v5909_v11 }
 0x2b1   :  { %v3709_v44 = vrot.slane %v3695_v34, %v5935_v10  ;;  %v3763_v22 = vcombine.low %v2338_v19, %v2342_v21  ;;  %v3770_v41 = vrot.slane %v3760_v63, %v5935_v10  ;;  %v2382_v0 = vrot.slane %v1466_v13, %v5912_v61 }
 0x2b2   :  { %v3777_v62 = vrot.slane %v3761_v60, %v5935_v10  ;;  %v3784_v58 = vrot.slane %v3762_v6, %v5935_v10  ;;  %v2386_v47 = vrot.slane %v1466_v13, %v5915_v59  ;;  %v2390_v27 = vrot.slane %v1466_v13, %v5918_v32 }
 0x2b3   :  { %v3710_v54 = vcombine.low %v3702_v43, %v3709_v44  ;;  %v3791_v37 = vrot.slane %v3763_v22, %v5935_v10  ;;  %v2394_v25 = vrot.slane %v1466_v13, %v5921_v8  ;;  %v2398_v45 = vrot.slane %v1466_v13, %v5924_v3 }
 0x2b4   :  { %v3792_v56 = vcombine.low %v3770_v41, %v3777_v62  ;;  %v2402_v15 = vrot.slane %v1466_v13, %v5928_v1  ;;  %v2406_v28 = vrot.slane %v1466_v13, %v5931_v7  ;;  %v3858_v24 = vcombine.low %v2378_v39, %v2382_v0 }
 0x2b5   :  { %4173 = vperm.xlu0 %4693, %v3710_v54   ;;  %v3793_v17 = vcombine.low %v3784_v58, %v3791_v37  ;;  %v3859_v40 = vcombine.low %v2386_v47, %v2390_v27  ;;  %v3860_v51 = vcombine.low %v2394_v25, %v2398_v45  ;;  %v3842_v5 = vcombine.low %v3833_v29, %v3840_v18  ;;  %v1475_v27 = vpop.xlane.xlu0 %1474 }
 0x2b6   :  { %v3800_v33 = vrot.slane %v3792_v56, %v5935_v10  ;;  %v3861_v38 = vcombine.low %v2402_v15, %v2406_v28  ;;  %v3868_v16 = vrot.slane %v3858_v24, %v5935_v10  ;;  %v3849_v13 = vrot.slane %v6276_v50, %v5935_v10 }
 0x2b7   :  { %v3807_v52 = vrot.slane %v3793_v17, %v5935_v10  ;;  %v3875_v46 = vrot.slane %v3859_v40, %v5935_v10  ;;  %v3882_v36 = vrot.slane %v3860_v51, %v5935_v10  ;;  %v2442_v30 = vrot.slane %v1472_v14, %v5909_v11  ;;  %v1478_v51 = vpop.xlane.xlu1 %1477 }
 0x2b8   :  { %v3889_v23 = vrot.slane %v3861_v38, %v5935_v10  ;;  %v2446_v31 = vrot.slane %v1472_v14, %v5912_v61  ;;  %v2450_v29 = vrot.slane %v1472_v14, %v5915_v59  ;;  %v2434_v18 = vrot.slane %v6237_v48, %v5928_v1 }
 0x2b9   :  { %v3808_v12 = vcombine.low %v3800_v33, %v3807_v52  ;;  %v3890_v9 = vcombine.low %v3868_v16, %v3875_v46  ;;  %v2454_v50 = vrot.slane %v1472_v14, %v5918_v32  ;;  %v2438_v49 = vrot.slane %v6237_v48, %v5931_v7 }
 0x2ba   :  { %v3891_v26 = vcombine.low %v3882_v36, %v3889_v23  ;;  %v2458_v34 = vrot.slane %v1472_v14, %v5921_v8  ;;  %v2462_v19 = vrot.slane %v1472_v14, %v5924_v3  ;;  %v2466_v21 = vrot.slane %v1472_v14, %v5928_v1 }
 0x2bb   :  { %4179 = vperm.xlu0 %4693, %v3808_v12   ;;  %v3898_v63 = vrot.slane %v3890_v9, %v5935_v10  ;;  %v3856_v43 = vrot.slane %v3842_v5, %v5935_v10  ;;  %v2470_v60 = vrot.slane %v1472_v14, %v5931_v7  ;;  %v3956_v6 = vcombine.low %v2442_v30, %v2446_v31 }
 0x2bc   :  { %v3905_v39 = vrot.slane %v3891_v26, %v5935_v10  ;;  %v3957_v44 = vcombine.low %v2450_v29, %v2454_v50  ;;  %v3958_v22 = vcombine.low %v2458_v34, %v2462_v19  ;;  %v3907_v41 = vcombine.low %v2410_v2, %v2414_v20 }
 0x2bd   :  { %v3959_v0 = vcombine.low %v2466_v21, %v2470_v60  ;;  %v3966_v62 = vrot.slane %v3956_v6, %v5935_v10  ;;  %v3908_v58 = vcombine.low %v2418_v57, %v2422_v35  ;;  %v3909_v47 = vcombine.low %v2426_v42, %v2430_v53 }
 0x2be   :  { %v3906_v54 = vcombine.low %v3898_v63, %v3905_v39  ;;  %v3973_v2 = vrot.slane %v3957_v44, %v5935_v10  ;;  %v3980_v20 = vrot.slane %v3958_v22, %v5935_v10  ;;  %v3910_v37 = vcombine.low %v2434_v18, %v2438_v49 }
 0x2bf   :  { %v3987_v25 = vrot.slane %v3959_v0, %v5935_v10  ;;  %v3917_v45 = vrot.slane %v3907_v41, %v5935_v10  ;;  %v3924_v57 = vrot.slane %v3908_v58, %v5935_v10  ;;  %v3931_v14 = vrot.slane %v3909_v47, %v5935_v10 }
 0x2c0   :  { %4185 = vperm.xlu0 %4693, %v3906_v54   ;;  %v3988_v35 = vcombine.low %v3966_v62, %v3973_v2  ;;  %v3938_v48 = vrot.slane %v3910_v37, %v5935_v10  ;;  %v2474_v56 = vrot.slane %v1475_v27, %v5909_v11  ;;  %v2478_v15 = vrot.slane %v1475_v27, %v5912_v61 }
 0x2c1   :  { %v3989_v42 = vcombine.low %v3980_v20, %v3987_v25  ;;  %v3939_v53 = vcombine.low %v3917_v45, %v3924_v57  ;;  %v3857_v28 = vcombine.low %v3849_v13, %v3856_v43  ;;  %v2482_v40 = vrot.slane %v1475_v27, %v5915_v59  ;;  %v4108_v20 = vpop.permute.xlu1 %4107 }
 0x2c2   :  { %v3996_v24 = vrot.slane %v3988_v35, %v5935_v10  ;;  %v3940_v17 = vcombine.low %v3931_v14, %v3938_v48  ;;  %v2486_v33 = vrot.slane %v1475_v27, %v5918_v32  ;;  %v2490_v16 = vrot.slane %v1475_v27, %v5921_v8 }
 0x2c3   :  { %v4003_v5 = vrot.slane %v3989_v42, %v5935_v10  ;;  %v3947_v38 = vrot.slane %v3939_v53, %v5935_v10  ;;  %v2494_v52 = vrot.slane %v1475_v27, %v5924_v3  ;;  %v2498_v46 = vrot.slane %v1475_v27, %v5928_v1  ;;  %v4105_v42 = vpop.permute.xlu0 %4104 }
 0x2c4   :  { %4182 = vperm.xlu0 %4693, %v3857_v28   ;;  %v3954_v13 = vrot.slane %v3940_v17, %v5935_v10  ;;  %v2502_v36 = vrot.slane %v1475_v27, %v5931_v7  ;;  %v4005_v30 = vcombine.low %v2474_v56, %v2478_v15  ;;  %v4006_v23 = vcombine.low %v2482_v40, %v2486_v33 }
 0x2c5   :  { %v4004_v31 = vcombine.low %v3996_v24, %v4003_v5  ;;  %v4007_v29 = vcombine.low %v2490_v16, %v2494_v52  ;;  %v2506_v18 = vrot.slane %v1478_v51, %v5909_v11  ;;  %v2510_v12 = vrot.slane %v1478_v51, %v5912_v61  ;;  %v4114_v37 = vpop.permute.xlu1 %4113 }
 0x2c6   :  { %v4008_v9 = vcombine.low %v2498_v46, %v2502_v36  ;;  %v4015_v50 = vrot.slane %v4005_v30, %v5935_v10  ;;  %v4022_v49 = vrot.slane %v4006_v23, %v5935_v10  ;;  %v2514_v34 = vrot.slane %v1478_v51, %v5915_v59 }
 0x2c7   :  { %v4029_v26 = vrot.slane %v4007_v29, %v5935_v10  ;;  %v2518_v19 = vrot.slane %v1478_v51, %v5918_v32  ;;  %v2522_v21 = vrot.slane %v1478_v51, %v5921_v8  ;;  %v3955_v63 = vcombine.low %v3947_v38, %v3954_v13 }
 0x2c8   :  { %4191 = vperm.xlu0 %4693, %v4004_v31   ;;  %v4036_v43 = vrot.slane %v4008_v9, %v5935_v10  ;;  %v4037_v11 = vcombine.low %v4015_v50, %v4022_v49  ;;  %v2526_v61 = vrot.slane %v1478_v51, %v5924_v3  ;;  %v2530_v60 = vrot.slane %v1478_v51, %v5928_v1 }
 0x2c9   :  { %v2534_v6 = vrot.slane %v1478_v51, %v5931_v7  ;;  %v4054_v39 = vcombine.low %v2506_v18, %v2510_v12  ;;  %v4055_v44 = vcombine.low %v2514_v34, %v2518_v19  ;;  %v4111_v25 = vpop.permute.xlu1 %4110  ;;  %v6468_v5 = vand.u32 127, %v1511_v4 }
 0x2ca   :  { %v4038_v22 = vcombine.low %v4029_v26, %v4036_v43  ;;  %v4045_v41 = vrot.slane %v4037_v11, %v5935_v10  ;;  %v4056_v59 = vcombine.low %v2522_v21, %v2526_v61 }
 0x2cb   :  { %v4057_v32 = vcombine.low %v2530_v60, %v2534_v6  ;;  %v4064_v8 = vrot.slane %v4054_v39, %v5935_v10  ;;  %v4071_v0 = vrot.slane %v4055_v44, %v5935_v10  ;;  %v4205_v38 = vadd.s32 4294967288, %v6468_v5 }
 0x2cc   :  { %4188 = vperm.xlu0 %4693, %v3955_v63   ;;  %v4052_v62 = vrot.slane %v4038_v22, %v5935_v10  ;;  %v4078_v3 = vrot.slane %v4056_v59, %v5935_v10  ;;  %v4212_v16 = vadd.s32 4294967280, %v6468_v5  ;;  %v4219_v36 = vadd.s32 4294967272, %v6468_v5 }
 0x2cd   :  { %v4085_v1 = vrot.slane %v4057_v32, %v5935_v10  ;;  %v4086_v58 = vcombine.low %v4064_v8, %v4071_v0  ;;  %v6449_v45 = vpop.permute.xlu1 %4119  ;;  %v4208_v13 = vsub.s32 %v4205_v38, %v5890_v55  ;;  %v4226_v23 = vadd.s32 4294967264, %v6468_v5 }
 0x2ce   :  { %v4053_v7 = vcombine.low %v4045_v41, %v4052_v62  ;;  %v6459_v56 = vpop.permute.xlu0 %4131  ;;  %v4215_v30 = vsub.s32 %v4212_v16, %v5890_v55  ;;  %v4203_v31 = vsub.s32 %v6468_v5, %v5890_v55  ;;  %v4240_v18 = vadd.s32 4294967248, %v6468_v5 }
 0x2cf   :  { %v4087_v47 = vcombine.low %v4078_v3, %v4085_v1  ;;  %v4094_v27 = vrot.slane %v4086_v58, %v5935_v10  ;;  %v4209_v29 = vrot.slane %v4108_v20, %v4208_v13  ;;  %v4222_v50 = vsub.s32 %v4219_v36, %v5890_v55 }
 0x2d0   :  { %4194 = vperm.xlu0 %4693, %v4053_v7   ;;  %v4216_v49 = vrot.slane %v4111_v25, %v4215_v30  ;;  %v4229_v26 = vsub.s32 %v4226_v23, %v5890_v55  ;;  %v4204_v19 = vrot.slane %v4105_v42, %v4203_v31  ;;  %v4233_v21 = vadd.s32 4294967256, %v6468_v5 }
 0x2d1   :  { %v4101_v54 = vrot.slane %v4087_v47, %v5935_v10  ;;  %v4117_v57 = vpop.permute.xlu1 %4116  ;;  %v4243_v11 = vsub.s32 %v4240_v18, %v5890_v55  ;;  %v4254_v44 = vadd.s32 4294967232, %v6468_v5  ;;  %v4223_v59 = vrot.slane %v4114_v37, %v4222_v50 }
 0x2d2   :  { %v4211_v43 = vsel %vm4210_vm2, %v4209_v29, %v4204_v19  ;;  %v4230_v39 = vrot.slane %v4117_v57, %v4229_v26  ;;  %v4236_v32 = vsub.s32 %v4233_v21, %v5890_v55  ;;  %v4247_v8 = vadd.s32 4294967240, %v6468_v5 }
 0x2d3   :  { %v4102_v2 = vcombine.low %v4094_v27, %v4101_v54  ;;  %v4218_v6 = vsel %vm4217_vm3, %v4216_v49, %v4211_v43  ;;  %v4268_v1 = vadd.s32 4294967216, %v6468_v5  ;;  %v4257_v54 = vsub.s32 %v4254_v44, %v5890_v55 }
 0x2d4   :  { %v4225_v3 = vsel %vm4224_vm4, %v4223_v59, %v4218_v6  ;;  %v4237_v37 = vrot.slane %v6449_v45, %v4236_v32  ;;  %v4250_v25 = vsub.s32 %v4247_v8, %v5890_v55  ;;  %v4261_v57 = vadd.s32 4294967224, %v6468_v5 }
 0x2d5   :  { %4197 = vperm.xlu0 %4693, %v4102_v2   ;;  %v6451_v35 = vpop.permute.xlu1 %4125  ;;  %v4232_v47 = vsel %vm4231_vm5, %v4230_v39, %v4225_v3  ;;  %v4282_v42 = vadd.s32 4294967200, %v6468_v5  ;;  %v4271_v38 = vsub.s32 %v4268_v1, %v5890_v55  ;;  %v4275_v23 = vadd.s32 4294967208, %v6468_v5 }
 0x2d6   :  { %v4251_v36 = vrot.slane %v6451_v35, %v4250_v25  ;;  %v4296_v18 = vadd.s32 4294967184, %v6468_v5  ;;  %v4303_v43 = vadd.s32 4294967176, %v6468_v5 }
 0x2d9   :  { %v6453_v14 = vpop.permute.xlu1 %4122 }
 0x2da   :  { %v4244_v27 = vrot.slane %v6453_v14, %v4243_v11 }
 0x2dd   :  { %v6455_v48 = vpop.permute.xlu1 %4128 }
 0x2de   :  { %v4258_v45 = vrot.slane %v6455_v48, %v4257_v54 }
 0x2e1   :  { %v6457_v53 = vpop.permute.xlu1 %4137 }
 0x2e5   :  { %v6461_v15 = vpop.permute.xlu1 %4134 }
 0x2e6   :  { %v4272_v49 = vrot.slane %v6461_v15, %v4271_v38  ;;  %v4299_v15 = vsub.s32 %v4296_v18, %v5890_v55 }
 0x2e9   :  { %v6463_v24 = vpop.permute.xlu1 %4143 }
 0x2ed   :  { %v6465_v40 = vpop.permute.xlu1 %4140 }
 0x2fb   :  { %v4153_v33 = vpop.permute.xlu1 %4152 }
 0x2fc   :  { %v4313_v63 = vrot.slane %v4153_v33, %v4203_v31  ;;  %v4289_v31 = vadd.s32 4294967192, %v6468_v5  ;;  %v4306_v5 = vsub.s32 %v4303_v43, %v5890_v55 }
 0x304   :  { %v4159_v46 = vpop.permute.xlu1 %4158 }
 0x305   :  { %v4322_v22 = vrot.slane %v4159_v46, %v4215_v30  ;;  %v4264_v30 = vsub.s32 %v4261_v57, %v5890_v55 }
 0x307   :  { %v4265_v21 = vrot.slane %v6459_v56, %v4264_v30 }
 0x309   :  { %v4165_v34 = vpop.permute.xlu1 %4164 }
 0x30a   :  { %v4332_v2 = vrot.slane %v4165_v34, %v4229_v26 }
 0x30e   :  { %v4171_v0 = vpop.permute.xlu1 %4170 }
 0x30f   :  { %v4342_v16 = vrot.slane %v4171_v0, %v4243_v11 }
 0x313   :  { %v4177_v46 = vpop.permute.xlu1 %4176 }
 0x314   :  { %v4352_v26 = vrot.slane %v4177_v46, %v4257_v54 }
 0x317   :  { %v4147_v11 = vpop.permute.xlu1 %4146 }
 0x31f   :  { %v4150_v0 = vpop.permute.xlu1 %4149 }
 0x325   :  { %v4156_v28 = vpop.permute.xlu0 %4155 }
 0x326   :  { %v4317_v12 = vrot.slane %v4156_v28, %v4208_v13 }
 0x328   :  { %v4318_v61 = vsel %vm4210_vm2, %v4317_v12, %v4313_v63  ;;  %v4278_v63 = vsub.s32 %v4275_v23, %v5890_v55 }
 0x329   :  { %v4323_v62 = vsel %vm4217_vm3, %v4322_v22, %v4318_v61 }
 0x32a   :  { %v4162_v17 = vpop.permute.xlu0 %4161  ;;  %v4279_v59 = vrot.slane %v6457_v53, %v4278_v63  ;;  %v4307_v53 = vrot.slane %v4150_v0, %v4306_v5 }
 0x32b   :  { %v4327_v60 = vrot.slane %v4162_v17, %v4222_v50  ;;  %v4239_v17 = vsel %vm4238_vm6, %v4237_v37, %v4232_v47 }
 0x32c   :  { %v4246_v33 = vsel %vm4245_vm7, %v4244_v27, %v4239_v17 }
 0x32d   :  { %v4328_v58 = vsel %vm4224_vm4, %v4327_v60, %v4323_v62  ;;  %v4253_v48 = vsel %vm4252_vm8, %v4251_v36, %v4246_v33  ;;  %v4292_v60 = vsub.s32 %v4289_v31, %v5890_v55 }
 0x32e   :  { %v4333_v28 = vsel %vm4231_vm5, %v4332_v2, %v4328_v58  ;;  %v4260_v50 = vsel %vm4259_vm9, %v4258_v45, %v4253_v48  ;;  %v4300_v58 = vrot.slane %v4147_v11, %v4299_v15 }
 0x32f   :  { %v4168_v51 = vpop.permute.xlu0 %4167  ;;  %v4293_v47 = vrot.slane %v6463_v24, %v4292_v60 }
 0x330   :  { %v4337_v7 = vrot.slane %v4168_v51, %v4236_v32 }
 0x332   :  { %v4338_v14 = vsel %vm4238_vm6, %v4337_v7, %v4333_v28 }
 0x333   :  { %v4343_v29 = vsel %vm4245_vm7, %v4342_v16, %v4338_v14 }
 0x334   :  { %v6472_v52 = vpop.permute.xlu0 %4173 }
 0x335   :  { %v4347_v51 = vrot.slane %v6472_v52, %v4250_v25  ;;  %v4285_v52 = vsub.s32 %v4282_v42, %v5890_v55 }
 0x337   :  { %v4348_v12 = vsel %vm4252_vm8, %v4347_v51, %v4343_v29  ;;  %v4286_v56 = vrot.slane %v6465_v40, %v4285_v52 }
 0x338   :  { %v4353_v61 = vsel %vm4259_vm9, %v4352_v26, %v4348_v12 }
 0x33a   :  { %v6481_v9 = vpop.permute.xlu0 %4179 }
 0x33b   :  { %v4357_v35 = vrot.slane %v6481_v9, %v4264_v30  ;;  %v4267_v9 = vsel %vm4266_vm10, %v4265_v21, %v4260_v50 }
 0x33c   :  { %v4274_v39 = vsel %vm4273_vm11, %v4272_v49, %v4267_v9 }
 0x33d   :  { %v4358_v6 = vsel %vm4266_vm10, %v4357_v35, %v4353_v61  ;;  %v4281_v62 = vsel %vm4280_vm12, %v4279_v59, %v4274_v39 }
 0x33e   :  { %v4288_v1 = vsel %vm4287_vm13, %v4286_v56, %v4281_v62 }
 0x33f   :  { %v6489_v41 = vpop.permute.xlu0 %4185  ;;  %v4295_v54 = vsel %vm4294_vm14, %v4293_v47, %v4288_v1 }
 0x340   :  { %v4367_v32 = vrot.slane %v6489_v41, %v4278_v63 }
 0x343   :  { %v4183_v20 = vpop.permute.xlu0 %4182 }
 0x344   :  { %v4362_v34 = vrot.slane %v4183_v20, %v4271_v38  ;;  %v4302_v20 = vsel %vm4301_vm15, %v4300_v58, %v4295_v54 }
 0x345   :  { %v4309_v25 = vsel %vm4308_vm0, %v4307_v53, %v4302_v20 }
 0x346   :  { %v4363_v44 = vsel %vm4273_vm11, %v4362_v34, %v4358_v6 }
 0x347   :  { %v4192_v13 = vpop.permute.xlu0 %4191  ;;  %v4368_v3 = vsel %vm4280_vm12, %v4367_v32, %v4363_v44 }
 0x348   :  { %v4377_v27 = vrot.slane %v4192_v13, %v4292_v60 }
 0x34b   :  { %v4189_v19 = vpop.permute.xlu0 %4188 }
 0x34c   :  { %v4372_v22 = vrot.slane %v4189_v19, %v4285_v52 }
 0x34e   :  { %v4373_v7 = vsel %vm4287_vm13, %v4372_v22, %v4368_v3 }
 0x34f   :  { %v4195_v8 = vpop.permute.xlu0 %4194  ;;  %v4378_v41 = vsel %vm4294_vm14, %v4377_v27, %v4373_v7 }
 0x350   :  { %v4382_v40 = vrot.slane %v4195_v8, %v4299_v15 }
 0x352   :  { %v4383_v37 = vsel %vm4301_vm15, %v4382_v40, %v4378_v41 }
 0x354   :  { %v4198_v55 = vpop.permute.xlu0 %4197 }
 0x355   :  { %v4387_v2 = vrot.slane %v4198_v55, %v4306_v5 }
 0x357   :  { %v4388_v57 = vsel %vm4308_vm0, %v4387_v2, %v4383_v37 }
 0x358   :  { %v4389_v42 = vcombine.low %v4309_v25, %v4388_v57 }
 0x35a   :  { %v4396_v28 = vrot.slane %v4389_v42, %v5935_v10 }
 0x35c   :  { %v4403_v24 = vrot.slane %v4396_v28, %v5935_v10 }
 0x35e   :  { %4409 = vst.msk [vmem:[#allocation2] sm:$0x3] %vm4407_vm1, %v4403_v24 }
 0x35f   :  { %4833 = shalt.err (!%p4830_p4)
}
 0x360   :  { %s4834_s25 = scalar_lea.hbm %s6559_s6, 32 }
 0x361   :  { %p4835_p5 = scmp.ne.s32.totalorder %s6559_s6, %s4834_s25  ;;  %p4838_p6 = scmp.lt.u32.totalorder %s4834_s25, %s6559_s6 }
 0x363   :  { %p4840_p7 = pnand %p4838_p6, %p4835_p5 }
 0x365   :  { %4843 = shalt.err (!%p4840_p7)
}
 0x366   :  { %4419 = dma.vmem_to_hbm [thread:$0]  %s4417_s3, 32, %s6559_s6, [#allocation3]  }
 0x367   :  { %4844 = dma.done.wait [#allocation3], 32  }
 0x368   :  { %4845 = vsyncadd [#allocation3], 4294967264 }
 0x369   :  { %4423 = vsyncpa [#allocation3], 1 }

</bundles_post_ra>
